<compile_context>
chip_gen: v7x
topology: tpu7x:2x2x1
jax: 0.10.0
libtpu: 0.0.40
codegen_flags: <defaults>
</compile_context>

<pallas_src>
import functools

import jax
import jax.numpy as jnp
import numpy as np
from jax.experimental import pallas as pl
from jax.experimental.pallas import tpu as pltpu

LOG_STD_MAX = 2.0
LOG_STD_MIN = -20.0
INCORPORATE = 7


# ----------------------------------------------------------------------------
# Pallas kernel: fused conv(-relu) chain in transposed im2col form
# ----------------------------------------------------------------------------
def _conv_chain_kernel(*refs, n_layers):
    """refs = [w_0, b_0, ..., w_{n-1}, b_{n-1}, patches, out].

    out = relu(w_{n-1} @ ... relu(w_0 @ patches + b_0) ... + b_{n-1})
    Layout: channels on sublanes, B*Ho*Wo on lanes (lane-dense stores).
    """
    p_ref = refs[2 * n_layers]
    o_ref = refs[2 * n_layers + 1]
    y = p_ref[...]
    for l in range(n_layers):
        w = refs[2 * l][...]
        b = refs[2 * l + 1][...]
        y = jnp.maximum(jnp.dot(w, y, preferred_element_type=jnp.float32) + b, 0.0)
    o_ref[...] = y


def _choose_m_tile(m_padded):
    """Pick a lane-dense tile that evenly divides the (128-aligned) M axis, so
    the grid can be sharded across TensorCores (v7x) without many tiny steps."""
    for tm in (512, 384, 256, 128):
        if m_padded % tm == 0 and m_padded // tm > 1:
            return tm
    return m_padded


def conv_chain(patches, layers):
    """Fused conv(-ReLU) chain.

    patches: (K, M) float, K = kh*kw*C_in, M = B*Ho*Wo.
    layers:  list of (w_mat (O, K_l), bias (O,)) applied in order, each + ReLU.
    Returns (O_last, M) float32.
    """
    K, M = patches.shape
    assert layers[0][0].shape[1] == K
    m_pad = ((M + 127) // 128) * 128
    if m_pad != M:
        patches = jnp.pad(patches, ((0, 0), (0, m_pad - M)))
    tm = _choose_m_tile(m_pad)
    grid = (m_pad // tm,)

    args, in_specs = [], []
    for w, b in layers:
        o, kl = w.shape
        args += [w.astype(jnp.float32), b.reshape(o, 1).astype(jnp.float32)]
        in_specs += [pl.BlockSpec((o, kl), lambda m: (0, 0)),
                     pl.BlockSpec((o, 1), lambda m: (0, 0))]
    args.append(patches.astype(jnp.float32))
    in_specs.append(pl.BlockSpec((K, tm), lambda m: (0, m)))
    o_last = layers[-1][0].shape[0]

    out = pl.pallas_call(
        functools.partial(_conv_chain_kernel, n_layers=len(layers)),
        grid=grid,
        out_shape=jax.ShapeDtypeStruct((o_last, m_pad), jnp.float32),
        in_specs=in_specs,
        out_specs=pl.BlockSpec((o_last, tm), lambda m: (0, m)),
        compiler_params=pltpu.CompilerParams(dimension_semantics=("parallel",)),
    )(*args)
    return out[:, :M]


# ----------------------------------------------------------------------------
# XLA-side im2col glue (fused under jit; produces the (K, M) matmul operand)
# ----------------------------------------------------------------------------
def _im2col_T(x, kh, kw, stride):
    """x: (C, B, H, W) -> patches (kh*kw*C, B*Ho*Wo); K ordered (kh, kw, C)."""
    C, B, H, W = x.shape
    Ho = (H - kh) // stride + 1
    Wo = (W - kw) // stride + 1
    cols = []
    for i in range(kh):
        for j in range(kw):
            cols.append(x[:, :, i:i + stride * (Ho - 1) + 1:stride,
                             j:j + stride * (Wo - 1) + 1:stride])   # (C, B, Ho, Wo)
    p = jnp.stack(cols, axis=0)                                     # (kh*kw, C, B, Ho, Wo)
    return p.reshape(kh * kw * C, B * Ho * Wo), (Ho, Wo)


def _conv_w_mat(w):
    """(O, C, kh, kw) torch conv weight -> (O, kh*kw*C) matching _im2col_T."""
    o = w.shape[0]
    return jnp.transpose(w, (0, 2, 3, 1)).reshape(o, -1)


# ----------------------------------------------------------------------------
# Pallas kernel: fused MLP + distribution head (single launch, weights in VMEM)
# ----------------------------------------------------------------------------
def _mlp_head_kernel(feat_ref, inf_ref, l2w_ref, l2b_ref,
                     h1x_ref, h1i_ref, h1b_ref, h2w_ref, h2b_ref,
                     act_ref, logpi_ref, *, act_limit, act_dim):
    # layer2: inform Linear + ReLU
    inf = jnp.maximum(
        jnp.dot(inf_ref[...], l2w_ref[...], preferred_element_type=jnp.float32)
        + l2b_ref[...], 0.0)
    # fused mu/log_std hidden layer: concat(feat, inf) @ [mu1 | ls1]
    #   == feat @ Wx + inf @ Wi  (avoids an in-kernel concat)
    h = (jnp.dot(feat_ref[...], h1x_ref[...], preferred_element_type=jnp.float32)
         + jnp.dot(inf, h1i_ref[...], preferred_element_type=jnp.float32)
         + h1b_ref[...])
    h = jnp.maximum(h, 0.0)
    # fused output layer (block-diagonal [mu2; ls2]) -> [mu | log_std]
    out2 = jnp.dot(h, h2w_ref[...], preferred_element_type=jnp.float32) + h2b_ref[...]
    mu = out2[:, :act_dim]
    log_std = jnp.clip(out2[:, act_dim:], LOG_STD_MIN, LOG_STD_MAX)

    pi = mu  # deterministic action = distribution mean
    # Independent(Normal(mu, std), 1).log_prob(mu) = sum(-log_std - 0.5*log(2*pi))
    log_pi = jnp.sum(-log_std - 0.5 * jnp.log(2.0 * jnp.pi), axis=-1, keepdims=True)
    # tanh-squash correction: 2*(log 2 - pi - softplus(-2*pi)) summed over act dim
    z = -2.0 * pi
    softplus = jnp.maximum(z, 0.0) + jnp.log1p(jnp.exp(-jnp.abs(z)))
    log_pi = log_pi - jnp.sum(2.0 * (jnp.log(2.0) - pi - softplus), axis=-1, keepdims=True)

    act_ref[...] = act_limit * jnp.tanh(pi)
    logpi_ref[...] = log_pi


def mlp_head(feat, inform, params, act_limit):
    B, nf = feat.shape
    hidden = params["mu1_b"].shape[0]
    act_dim = params["mu2_b"].shape[0]
    b_pad = ((B + 7) // 8) * 8                       # dense sublanes
    if b_pad != B:
        feat = jnp.pad(feat, ((0, b_pad - B), (0, 0)))
        inform = jnp.pad(inform, ((0, b_pad - B), (0, 0)))

    f32 = jnp.float32
    # fuse mu / log_std branches: [mu1 | ls1] (864 -> 2H) and block-diag (2H -> 2A)
    h1x_w = jnp.concatenate([params["mu1_w"][:nf], params["ls1_w"][:nf]], axis=1)
    h1i_w = jnp.concatenate([params["mu1_w"][nf:], params["ls1_w"][nf:]], axis=1)
    h1_b = jnp.concatenate([params["mu1_b"], params["ls1_b"]]).reshape(1, -1)
    h2_w = jnp.zeros((2 * hidden, 2 * act_dim), f32)
    h2_w = h2_w.at[:hidden, :act_dim].set(params["mu2_w"])
    h2_w = h2_w.at[hidden:, act_dim:].set(params["ls2_w"])
    h2_b = jnp.concatenate([params["mu2_b"], params["ls2_b"]]).reshape(1, -1)

    vm = pl.BlockSpec(memory_space=pltpu.MemorySpace.VMEM)
    act, log_pi = pl.pallas_call(
        functools.partial(_mlp_head_kernel, act_limit=float(act_limit), act_dim=act_dim),
        out_shape=(jax.ShapeDtypeStruct((b_pad, act_dim), f32),
                   jax.ShapeDtypeStruct((b_pad, 1), f32)),
        in_specs=[vm] * 9,
        out_specs=(vm, vm),
    )(feat.astype(f32), inform.astype(f32),
      params["l2_w"].astype(f32), params["l2_b"].reshape(1, -1).astype(f32),
      h1x_w.astype(f32), h1i_w.astype(f32), h1_b.astype(f32),
      h2_w, h2_b.astype(f32))
    return act[:B], log_pi[:B, 0]


# ----------------------------------------------------------------------------
# Actor forward (continuous branch, deterministic=True, with_logprob=True)
# ----------------------------------------------------------------------------
def actor_forward(params, img, inform, act_limit):
    # Keep activations in (C, B, H, W): channels on sublanes, B*H*W on lanes of
    # the transposed im2col matmul -> no per-layer layout transposes.
    x = jnp.transpose(img.astype(jnp.float32), (1, 0, 2, 3))            # (C, B, H, W)
    B = img.shape[0]

    # conv1 8x8/4 (1/255 normalization folded into its weights)
    w1m = _conv_w_mat(params["c1_w"]) * (1.0 / 255.0)
    p1, (ho1, wo1) = _im2col_T(x, 8, 8, 4)
    y1 = conv_chain(p1, [(w1m, params["c1_b"])]).reshape(16, B, ho1, wo1)

    # conv2 4x4/2
    p2, (ho2, wo2) = _im2col_T(y1, 4, 4, 2)
    y2 = conv_chain(p2, [(_conv_w_mat(params["c2_w"]), params["c2_b"])]
                    ).reshape(32, B, ho2, wo2)

    # conv3 3x3/2 fused with conv4 1x1/1 (single pallas_call)
    p3, (ho3, wo3) = _im2col_T(y2, 3, 3, 2)
    y4 = conv_chain(p3, [(_conv_w_mat(params["c3_w"]), params["c3_b"]),
                         (_conv_w_mat(params["c4_w"]), params["c4_b"])])
    y4 = y4.reshape(32, B, ho3, wo3)

    # Flatten exactly like torch .view on NCHW (B, 32, 5, 5): C-major ordering.
    feat = jnp.transpose(y4, (1, 0, 2, 3)).reshape(B, -1)               # (B, 800)

    # fused inform-linear + mu/log_std heads + clamp/tanh-squash/log-prob
    return mlp_head(feat, inform, params, act_limit)


# ----------------------------------------------------------------------------
# Plain-JAX reference (for correctness check)
# ----------------------------------------------------------------------------
def actor_forward_ref(params, img, inform, act_limit):
    def conv(x, w, b, s):
        y = jax.lax.conv_general_dilated(
            x, w, (s, s), "VALID",
            dimension_numbers=("NCHW", "OIHW", "NCHW"))
        return jnp.maximum(y + b[None, :, None, None], 0.0)

    x = img.astype(jnp.float32) / 255.0
    x = conv(x, params["c1_w"], params["c1_b"], 4)
    x = conv(x, params["c2_w"], params["c2_b"], 2)
    x = conv(x, params["c3_w"], params["c3_b"], 2)
    x = conv(x, params["c4_w"], params["c4_b"], 1)
    x = x.reshape(x.shape[0], -1)
    inf = jnp.maximum(inform @ params["l2_w"] + params["l2_b"], 0.0)
    x = jnp.concatenate([x, inf], axis=-1)
    h_mu = jnp.maximum(x @ params["mu1_w"] + params["mu1_b"], 0.0)
    mu = h_mu @ params["mu2_w"] + params["mu2_b"]
    h_ls = jnp.maximum(x @ params["ls1_w"] + params["ls1_b"], 0.0)
    log_std = jnp.clip(h_ls @ params["ls2_w"] + params["ls2_b"], LOG_STD_MIN, LOG_STD_MAX)
    pi = mu
    log_pi = jnp.sum(-log_std - 0.5 * jnp.log(2.0 * jnp.pi), axis=-1)
    log_pi -= jnp.sum(2.0 * (jnp.log(2.0) - pi - jax.nn.softplus(-2.0 * pi)), axis=1)
    return act_limit * jnp.tanh(pi), log_pi


# ----------------------------------------------------------------------------
# Deterministic parameter construction
# ----------------------------------------------------------------------------
def make_params(key, num_inputs, hidden_size, act_dim):
    ks = jax.random.split(key, 10)

    def w(k, shape, fan_in):
        return jax.random.normal(k, shape, jnp.float32) * (1.0 / np.sqrt(fan_in))

    p = {}
    p["c1_w"] = w(ks[0], (16, num_inputs, 8, 8), num_inputs * 64)
    p["c1_b"] = jnp.zeros((16,), jnp.float32)
    p["c2_w"] = w(ks[1], (32, 16, 4, 4), 16 * 16)
    p["c2_b"] = jnp.zeros((32,), jnp.float32)
    p["c3_w"] = w(ks[2], (64, 32, 3, 3), 32 * 9)
    p["c3_b"] = jnp.zeros((64,), jnp.float32)
    p["c4_w"] = w(ks[3], (32, 64, 1, 1), 64)
    p["c4_b"] = jnp.zeros((32,), jnp.float32)
    p["l2_w"] = w(ks[4], (INCORPORATE, 64), INCORPORATE)
    p["l2_b"] = jnp.zeros((64,), jnp.float32)
    p["mu1_w"] = w(ks[5], (800 + 64, hidden_size), 864)
    p["mu1_b"] = jnp.zeros((hidden_size,), jnp.float32)
    p["mu2_w"] = w(ks[6], (hidden_size, act_dim), hidden_size)
    p["mu2_b"] = jnp.zeros((act_dim,), jnp.float32)
    p["ls1_w"] = w(ks[7], (800 + 64, hidden_size), 864)
    p["ls1_b"] = jnp.zeros((hidden_size,), jnp.float32)
    p["ls2_w"] = w(ks[8], (hidden_size, act_dim), hidden_size)
    p["ls2_b"] = jnp.zeros((act_dim,), jnp.float32)
    return p


if __name__ == "__main__":
    # The Linear(800+64, ...) layers pin the conv trunk output to 32*5*5=800,
    # which implies a 100x100 input image (smallest valid spatial size).
    B, C, H, W = 2, 4, 100, 100
    hidden_size, act_dim, act_limit = 64, 2, 1.0

    key = jax.random.PRNGKey(0)
    k_img, k_inf, k_par = jax.random.split(key, 3)
    img = jax.random.uniform(k_img, (B, C, H, W), jnp.float32, 0.0, 255.0)
    inform = jax.random.normal(k_inf, (B, INCORPORATE), jnp.float32)
    params = make_params(k_par, C, hidden_size, act_dim)

    fwd = jax.jit(actor_forward, static_argnums=(3,))
    pi_action, log_pi = fwd(params, img, inform, act_limit)
    pi_action = jax.block_until_ready(pi_action)
    log_pi = jax.block_until_ready(log_pi)

    pi_ref, logpi_ref = actor_forward_ref(params, img, inform, act_limit)
    np.testing.assert_allclose(np.asarray(pi_action), np.asarray(pi_ref),
                               rtol=1e-2, atol=1e-2)
    np.testing.assert_allclose(np.asarray(log_pi), np.asarray(logpi_ref),
                               rtol=1e-2, atol=1e-2)

    # TODO(synk): stochastic branch (rsample) and discrete Categorical branch are
    # not implemented; this covers forward(deterministic=True, with_logprob=True).
    print("KERNEL_OK")
</pallas_src>

<mosaic_0001>
module attributes {stable_mosaic.version = 11 : i64} {
  func.func @_conv_chain_kernel(%arg0: i32, %arg1: memref<16x256xf32, #tpu.memory_space<vmem>>, %arg2: memref<16x1xf32, #tpu.memory_space<vmem>>, %arg3: memref<256x384xf32, #tpu.memory_space<vmem>>, %arg4: memref<16x384xf32, #tpu.memory_space<vmem>>) attributes {dimension_semantics = [#tpu.dimension_semantics<parallel>], iteration_bounds = array<i64: 3>, scalar_prefetch = 0 : i64, scratch_operands = 0 : i64, tpu.core_type = #tpu.core_type<tc>, window_params = [{pipeline_mode = #tpu.pipeline_mode<synchronous>, transform_indices = @transform_0, window_bounds = array<i64: 16, 256>}, {pipeline_mode = #tpu.pipeline_mode<synchronous>, transform_indices = @transform_1, window_bounds = array<i64: 16, 1>}, {transform_indices = @transform_2, window_bounds = array<i64: 256, 384>}, {transform_indices = @transform_3, window_bounds = array<i64: 16, 384>}]} {
    %c0 = arith.constant 0 : index
    %c0_0 = arith.constant 0 : index
    %0 = vector.load %arg3[%c0, %c0_0] : memref<256x384xf32, #tpu.memory_space<vmem>>, vector<256x384xf32>
    %c0_1 = arith.constant 0 : index
    %c0_2 = arith.constant 0 : index
    %1 = vector.load %arg1[%c0_1, %c0_2] : memref<16x256xf32, #tpu.memory_space<vmem>>, vector<16x256xf32>
    %c0_3 = arith.constant 0 : index
    %c0_4 = arith.constant 0 : index
    %2 = vector.load %arg2[%c0_3, %c0_4] : memref<16x1xf32, #tpu.memory_space<vmem>>, vector<16x1xf32>
    %cst = arith.constant dense<0.000000e+00> : vector<16x384xf32>
    %3 = tpu.matmul %1, %0, %cst {dimension_numbers = #tpu.dot_dimension_numbers<[1], [0], [0], [1], [0, 0, 1, 1], [], []>} : vector<16x256xf32>, vector<256x384xf32>, vector<16x384xf32> -> vector<16x384xf32>
    %4 = vector.broadcast %2 : vector<16x1xf32> to vector<16x384xf32>
    %5 = arith.addf %3, %4 : vector<16x384xf32>
    %cst_5 = arith.constant 0.000000e+00 : f32
    %6 = vector.broadcast %cst_5 : f32 to vector<16x384xf32>
    %7 = arith.maximumf %5, %6 : vector<16x384xf32>
    %c0_6 = arith.constant 0 : index
    %c0_7 = arith.constant 0 : index
    %8 = vector.load %arg4[%c0_6, %c0_7] : memref<16x384xf32, #tpu.memory_space<vmem>>, vector<16x384xf32>
    tpu.vector_store %arg4[%c0_6, %c0_7], %7 {strides = array<i32>} : memref<16x384xf32, #tpu.memory_space<vmem>>, vector<16x384xf32>,
    return
  }
  func.func @transform_0(%arg0: i32) -> (i32, i32) {
    %c0_i32 = arith.constant 0 : i32
    %c0_i32_0 = arith.constant 0 : i32
    %c0_i32_1 = arith.constant 0 : i32
    return %c0_i32, %c0_i32_0 : i32, i32
  }
  func.func @transform_1(%arg0: i32) -> (i32, i32) {
    %c0_i32 = arith.constant 0 : i32
    %c0_i32_0 = arith.constant 0 : i32
    %c0_i32_1 = arith.constant 0 : i32
    return %c0_i32, %c0_i32_0 : i32, i32
  }
  func.func @transform_2(%arg0: i32) -> (i32, i32) {
    %c0_i32 = arith.constant 0 : i32
    %c0_i32_0 = arith.constant 0 : i32
    return %c0_i32, %arg0 : i32, i32
  }
  func.func @transform_3(%arg0: i32) -> (i32, i32) {
    %c0_i32 = arith.constant 0 : i32
    %c0_i32_0 = arith.constant 0 : i32
    return %c0_i32, %arg0 : i32, i32
  }
}

module attributes {stable_mosaic.version = 11 : i64} {
  func.func @_conv_chain_kernel(%arg0: i32, %arg1: memref<32x256xf32, #tpu.memory_space<vmem>>, %arg2: memref<32x1xf32, #tpu.memory_space<vmem>>, %arg3: memref<256x128xf32, #tpu.memory_space<vmem>>, %arg4: memref<32x128xf32, #tpu.memory_space<vmem>>) attributes {dimension_semantics = [#tpu.dimension_semantics<parallel>], iteration_bounds = array<i64: 2>, scalar_prefetch = 0 : i64, scratch_operands = 0 : i64, tpu.core_type = #tpu.core_type<tc>, window_params = [{pipeline_mode = #tpu.pipeline_mode<synchronous>, transform_indices = @transform_0, window_bounds = array<i64: 32, 256>}, {pipeline_mode = #tpu.pipeline_mode<synchronous>, transform_indices = @transform_1, window_bounds = array<i64: 32, 1>}, {transform_indices = @transform_2, window_bounds = array<i64: 256, 128>}, {transform_indices = @transform_3, window_bounds = array<i64: 32, 128>}]} {
    %c0 = arith.constant 0 : index
    %c0_0 = arith.constant 0 : index
    %0 = vector.load %arg3[%c0, %c0_0] : memref<256x128xf32, #tpu.memory_space<vmem>>, vector<256x128xf32>
    %c0_1 = arith.constant 0 : index
    %c0_2 = arith.constant 0 : index
    %1 = vector.load %arg1[%c0_1, %c0_2] : memref<32x256xf32, #tpu.memory_space<vmem>>, vector<32x256xf32>
    %c0_3 = arith.constant 0 : index
    %c0_4 = arith.constant 0 : index
    %2 = vector.load %arg2[%c0_3, %c0_4] : memref<32x1xf32, #tpu.memory_space<vmem>>, vector<32x1xf32>
    %cst = arith.constant dense<0.000000e+00> : vector<32x128xf32>
    %3 = tpu.matmul %1, %0, %cst {dimension_numbers = #tpu.dot_dimension_numbers<[1], [0], [0], [1], [0, 0, 1, 1], [], []>} : vector<32x256xf32>, vector<256x128xf32>, vector<32x128xf32> -> vector<32x128xf32>
    %4 = vector.broadcast %2 : vector<32x1xf32> to vector<32x128xf32>
    %5 = arith.addf %3, %4 : vector<32x128xf32>
    %cst_5 = arith.constant 0.000000e+00 : f32
    %6 = vector.broadcast %cst_5 : f32 to vector<32x128xf32>
    %7 = arith.maximumf %5, %6 : vector<32x128xf32>
    %c0_6 = arith.constant 0 : index
    %c0_7 = arith.constant 0 : index
    %8 = vector.load %arg4[%c0_6, %c0_7] : memref<32x128xf32, #tpu.memory_space<vmem>>, vector<32x128xf32>
    tpu.vector_store %arg4[%c0_6, %c0_7], %7 {strides = array<i32>} : memref<32x128xf32, #tpu.memory_space<vmem>>, vector<32x128xf32>,
    return
  }
  func.func @transform_0(%arg0: i32) -> (i32, i32) {
    %c0_i32 = arith.constant 0 : i32
    %c0_i32_0 = arith.constant 0 : i32
    %c0_i32_1 = arith.constant 0 : i32
    return %c0_i32, %c0_i32_0 : i32, i32
  }
  func.func @transform_1(%arg0: i32) -> (i32, i32) {
    %c0_i32 = arith.constant 0 : i32
    %c0_i32_0 = arith.constant 0 : i32
    %c0_i32_1 = arith.constant 0 : i32
    return %c0_i32, %c0_i32_0 : i32, i32
  }
  func.func @transform_2(%arg0: i32) -> (i32, i32) {
    %c0_i32 = arith.constant 0 : i32
    %c0_i32_0 = arith.constant 0 : i32
    return %c0_i32, %arg0 : i32, i32
  }
  func.func @transform_3(%arg0: i32) -> (i32, i32) {
    %c0_i32 = arith.constant 0 : i32
    %c0_i32_0 = arith.constant 0 : i32
    return %c0_i32, %arg0 : i32, i32
  }
}

module attributes {stable_mosaic.version = 11 : i64} {
  func.func @_conv_chain_kernel(%arg0: i32, %arg1: memref<64x288xf32, #tpu.memory_space<vmem>>, %arg2: memref<64x1xf32, #tpu.memory_space<vmem>>, %arg3: memref<32x64xf32, #tpu.memory_space<vmem>>, %arg4: memref<32x1xf32, #tpu.memory_space<vmem>>, %arg5: memref<288x128xf32, #tpu.memory_space<vmem>>, %arg6: memref<32x128xf32, #tpu.memory_space<vmem>>) attributes {dimension_semantics = [#tpu.dimension_semantics<parallel>], iteration_bounds = array<i64: 1>, scalar_prefetch = 0 : i64, scratch_operands = 0 : i64, tpu.core_type = #tpu.core_type<tc>, window_params = [{pipeline_mode = #tpu.pipeline_mode<synchronous>, transform_indices = @transform_0, window_bounds = array<i64: 64, 288>}, {pipeline_mode = #tpu.pipeline_mode<synchronous>, transform_indices = @transform_1, window_bounds = array<i64: 64, 1>}, {pipeline_mode = #tpu.pipeline_mode<synchronous>, transform_indices = @transform_2, window_bounds = array<i64: 32, 64>}, {pipeline_mode = #tpu.pipeline_mode<synchronous>, transform_indices = @transform_3, window_bounds = array<i64: 32, 1>}, {transform_indices = @transform_4, window_bounds = array<i64: 288, 128>}, {transform_indices = @transform_5, window_bounds = array<i64: 32, 128>}]} {
    %c0 = arith.constant 0 : index
    %c0_0 = arith.constant 0 : index
    %0 = vector.load %arg5[%c0, %c0_0] : memref<288x128xf32, #tpu.memory_space<vmem>>, vector<288x128xf32>
    %c0_1 = arith.constant 0 : index
    %c0_2 = arith.constant 0 : index
    %1 = vector.load %arg1[%c0_1, %c0_2] : memref<64x288xf32, #tpu.memory_space<vmem>>, vector<64x288xf32>
    %c0_3 = arith.constant 0 : index
    %c0_4 = arith.constant 0 : index
    %2 = vector.load %arg2[%c0_3, %c0_4] : memref<64x1xf32, #tpu.memory_space<vmem>>, vector<64x1xf32>
    %cst = arith.constant dense<0.000000e+00> : vector<64x128xf32>
    %3 = tpu.matmul %1, %0, %cst {dimension_numbers = #tpu.dot_dimension_numbers<[1], [0], [0], [1], [0, 0, 1, 1], [], []>} : vector<64x288xf32>, vector<288x128xf32>, vector<64x128xf32> -> vector<64x128xf32>
    %4 = vector.broadcast %2 : vector<64x1xf32> to vector<64x128xf32>
    %5 = arith.addf %3, %4 : vector<64x128xf32>
    %cst_5 = arith.constant 0.000000e+00 : f32
    %6 = vector.broadcast %cst_5 : f32 to vector<64x128xf32>
    %7 = arith.maximumf %5, %6 : vector<64x128xf32>
    %c0_6 = arith.constant 0 : index
    %c0_7 = arith.constant 0 : index
    %8 = vector.load %arg3[%c0_6, %c0_7] : memref<32x64xf32, #tpu.memory_space<vmem>>, vector<32x64xf32>
    %c0_8 = arith.constant 0 : index
    %c0_9 = arith.constant 0 : index
    %9 = vector.load %arg4[%c0_8, %c0_9] : memref<32x1xf32, #tpu.memory_space<vmem>>, vector<32x1xf32>
    %cst_10 = arith.constant dense<0.000000e+00> : vector<32x128xf32>
    %10 = tpu.matmul %8, %7, %cst_10 {dimension_numbers = #tpu.dot_dimension_numbers<[1], [0], [0], [1], [0, 0, 1, 1], [], []>} : vector<32x64xf32>, vector<64x128xf32>, vector<32x128xf32> -> vector<32x128xf32>
    %11 = vector.broadcast %9 : vector<32x1xf32> to vector<32x128xf32>
    %12 = arith.addf %10, %11 : vector<32x128xf32>
    %cst_11 = arith.constant 0.000000e+00 : f32
    %13 = vector.broadcast %cst_11 : f32 to vector<32x128xf32>
    %14 = arith.maximumf %12, %13 : vector<32x128xf32>
    %c0_12 = arith.constant 0 : index
    %c0_13 = arith.constant 0 : index
    %15 = vector.load %arg6[%c0_12, %c0_13] : memref<32x128xf32, #tpu.memory_space<vmem>>, vector<32x128xf32>
    tpu.vector_store %arg6[%c0_12, %c0_13], %14 {strides = array<i32>} : memref<32x128xf32, #tpu.memory_space<vmem>>, vector<32x128xf32>,
    return
  }
  func.func @transform_0(%arg0: i32) -> (i32, i32) {
    %c0_i32 = arith.constant 0 : i32
    %c0_i32_0 = arith.constant 0 : i32
    %c0_i32_1 = arith.constant 0 : i32
    return %c0_i32, %c0_i32_0 : i32, i32
  }
  func.func @transform_1(%arg0: i32) -> (i32, i32) {
    %c0_i32 = arith.constant 0 : i32
    %c0_i32_0 = arith.constant 0 : i32
    %c0_i32_1 = arith.constant 0 : i32
    return %c0_i32, %c0_i32_0 : i32, i32
  }
  func.func @transform_2(%arg0: i32) -> (i32, i32) {
    %c0_i32 = arith.constant 0 : i32
    %c0_i32_0 = arith.constant 0 : i32
    %c0_i32_1 = arith.constant 0 : i32
    return %c0_i32, %c0_i32_0 : i32, i32
  }
  func.func @transform_3(%arg0: i32) -> (i32, i32) {
    %c0_i32 = arith.constant 0 : i32
    %c0_i32_0 = arith.constant 0 : i32
    %c0_i32_1 = arith.constant 0 : i32
    return %c0_i32, %c0_i32_0 : i32, i32
  }
  func.func @transform_4(%arg0: i32) -> (i32, i32) {
    %c0_i32 = arith.constant 0 : i32
    %c0_i32_0 = arith.constant 0 : i32
    return %c0_i32, %arg0 : i32, i32
  }
  func.func @transform_5(%arg0: i32) -> (i32, i32) {
    %c0_i32 = arith.constant 0 : i32
    %c0_i32_0 = arith.constant 0 : i32
    return %c0_i32, %arg0 : i32, i32
  }
}

module attributes {stable_mosaic.version = 11 : i64} {
  func.func @_mlp_head_kernel(%arg0: memref<8x800xf32, #tpu.memory_space<vmem>>, %arg1: memref<8x7xf32, #tpu.memory_space<vmem>>, %arg2: memref<7x64xf32, #tpu.memory_space<vmem>>, %arg3: memref<1x64xf32, #tpu.memory_space<vmem>>, %arg4: memref<800x128xf32, #tpu.memory_space<vmem>>, %arg5: memref<64x128xf32, #tpu.memory_space<vmem>>, %arg6: memref<1x128xf32, #tpu.memory_space<vmem>>, %arg7: memref<128x4xf32, #tpu.memory_space<vmem>>, %arg8: memref<1x4xf32, #tpu.memory_space<vmem>>, %arg9: memref<8x2xf32, #tpu.memory_space<vmem>>, %arg10: memref<8x1xf32, #tpu.memory_space<vmem>>) attributes {dimension_semantics = [], scalar_prefetch = 0 : i64, scratch_operands = 0 : i64, tpu.core_type = #tpu.core_type<tc>} {
    %c0 = arith.constant 0 : index
    %c0_0 = arith.constant 0 : index
    %0 = vector.load %arg1[%c0, %c0_0] : memref<8x7xf32, #tpu.memory_space<vmem>>, vector<8x7xf32>
    %c0_1 = arith.constant 0 : index
    %c0_2 = arith.constant 0 : index
    %1 = vector.load %arg2[%c0_1, %c0_2] : memref<7x64xf32, #tpu.memory_space<vmem>>, vector<7x64xf32>
    %cst = arith.constant dense<0.000000e+00> : vector<8x64xf32>
    %2 = tpu.matmul %0, %1, %cst {dimension_numbers = #tpu.dot_dimension_numbers<[1], [0], [0], [1], [0, 0, 1, 1], [], []>} : vector<8x7xf32>, vector<7x64xf32>, vector<8x64xf32> -> vector<8x64xf32>
    %c0_3 = arith.constant 0 : index
    %c0_4 = arith.constant 0 : index
    %3 = vector.load %arg3[%c0_3, %c0_4] : memref<1x64xf32, #tpu.memory_space<vmem>>, vector<1x64xf32>
    %4 = vector.broadcast %3 : vector<1x64xf32> to vector<8x64xf32>
    %5 = arith.addf %2, %4 : vector<8x64xf32>
    %cst_5 = arith.constant 0.000000e+00 : f32
    %6 = vector.broadcast %cst_5 : f32 to vector<8x64xf32>
    %7 = arith.maximumf %5, %6 : vector<8x64xf32>
    %c0_6 = arith.constant 0 : index
    %c0_7 = arith.constant 0 : index
    %8 = vector.load %arg0[%c0_6, %c0_7] : memref<8x800xf32, #tpu.memory_space<vmem>>, vector<8x800xf32>
    %c0_8 = arith.constant 0 : index
    %c0_9 = arith.constant 0 : index
    %9 = vector.load %arg4[%c0_8, %c0_9] : memref<800x128xf32, #tpu.memory_space<vmem>>, vector<800x128xf32>
    %cst_10 = arith.constant dense<0.000000e+00> : vector<8x128xf32>
    %10 = tpu.matmul %8, %9, %cst_10 {dimension_numbers = #tpu.dot_dimension_numbers<[1], [0], [0], [1], [0, 0, 1, 1], [], []>} : vector<8x800xf32>, vector<800x128xf32>, vector<8x128xf32> -> vector<8x128xf32>
    %c0_11 = arith.constant 0 : index
    %c0_12 = arith.constant 0 : index
    %11 = vector.load %arg5[%c0_11, %c0_12] : memref<64x128xf32, #tpu.memory_space<vmem>>, vector<64x128xf32>
    %cst_13 = arith.constant dense<0.000000e+00> : vector<8x128xf32>
    %12 = tpu.matmul %7, %11, %cst_13 {dimension_numbers = #tpu.dot_dimension_numbers<[1], [0], [0], [1], [0, 0, 1, 1], [], []>} : vector<8x64xf32>, vector<64x128xf32>, vector<8x128xf32> -> vector<8x128xf32>
    %13 = arith.addf %10, %12 : vector<8x128xf32>
    %c0_14 = arith.constant 0 : index
    %c0_15 = arith.constant 0 : index
    %14 = vector.load %arg6[%c0_14, %c0_15] : memref<1x128xf32, #tpu.memory_space<vmem>>, vector<1x128xf32>
    %15 = vector.broadcast %14 : vector<1x128xf32> to vector<8x128xf32>
    %16 = arith.addf %13, %15 : vector<8x128xf32>
    %cst_16 = arith.constant 0.000000e+00 : f32
    %17 = vector.broadcast %cst_16 : f32 to vector<8x128xf32>
    %18 = arith.maximumf %16, %17 : vector<8x128xf32>
    %c0_17 = arith.constant 0 : index
    %c0_18 = arith.constant 0 : index
    %19 = vector.load %arg7[%c0_17, %c0_18] : memref<128x4xf32, #tpu.memory_space<vmem>>, vector<128x4xf32>
    %cst_19 = arith.constant dense<0.000000e+00> : vector<8x4xf32>
    %20 = tpu.matmul %18, %19, %cst_19 {dimension_numbers = #tpu.dot_dimension_numbers<[1], [0], [0], [1], [0, 0, 1, 1], [], []>} : vector<8x128xf32>, vector<128x4xf32>, vector<8x4xf32> -> vector<8x4xf32>
    %c0_20 = arith.constant 0 : index
    %c0_21 = arith.constant 0 : index
    %21 = vector.load %arg8[%c0_20, %c0_21] : memref<1x4xf32, #tpu.memory_space<vmem>>, vector<1x4xf32>
    %22 = vector.broadcast %21 : vector<1x4xf32> to vector<8x4xf32>
    %23 = arith.addf %20, %22 : vector<8x4xf32>
    %24 = vector.extract_strided_slice %23 {offsets = [0, 0], sizes = [8, 2], strides = [1, 1]} : vector<8x4xf32> to vector<8x2xf32>
    %25 = vector.extract_strided_slice %23 {offsets = [0, 2], sizes = [8, 2], strides = [1, 1]} : vector<8x4xf32> to vector<8x2xf32>
    %cst_22 = arith.constant -2.000000e+01 : f32
    %cst_23 = arith.constant 2.000000e+00 : f32
    %26 = vector.broadcast %cst_22 : f32 to vector<8x2xf32>
    %27 = arith.maximumf %26, %25 : vector<8x2xf32>
    %28 = vector.broadcast %cst_23 : f32 to vector<8x2xf32>
    %29 = arith.minimumf %28, %27 : vector<8x2xf32>
    %cst_24 = arith.constant 0.000000e+00 : f32
    %30 = vector.broadcast %cst_24 : f32 to vector<8x2xf32>
    %31 = arith.subf %30, %29 : vector<8x2xf32>
    %cst_25 = arith.constant 6.28318548 : f32
    %32 = math.log %cst_25 : f32
    %cst_26 = arith.constant 5.000000e-01 : f32
    %33 = arith.mulf %cst_26, %32 : f32
    %34 = vector.broadcast %33 : f32 to vector<8x2xf32>
    %35 = arith.subf %31, %34 : vector<8x2xf32>
    %cst_27 = arith.constant dense<0.000000e+00> : vector<8xf32>
    %36 = vector.multi_reduction <add>, %35, %cst_27 [1] : vector<8x2xf32> to vector<8xf32>
    %37 = vector.shape_cast %36 : vector<8xf32> to vector<8x1xf32>
    %cst_28 = arith.constant -2.000000e+00 : f32
    %38 = vector.broadcast %cst_28 : f32 to vector<8x2xf32>
    %39 = arith.mulf %38, %24 : vector<8x2xf32>
    %cst_29 = arith.constant 0.000000e+00 : f32
    %40 = vector.broadcast %cst_29 : f32 to vector<8x2xf32>
    %41 = arith.maximumf %39, %40 : vector<8x2xf32>
    %42 = math.absf %39 : vector<8x2xf32>
    %cst_30 = arith.constant 0.000000e+00 : f32
    %43 = vector.broadcast %cst_30 : f32 to vector<8x2xf32>
    %44 = arith.subf %43, %42 : vector<8x2xf32>
    %45 = math.exp %44 : vector<8x2xf32>
    %46 = math.log1p %45 : vector<8x2xf32>
    %47 = arith.addf %41, %46 : vector<8x2xf32>
    %cst_31 = arith.constant 2.000000e+00 : f32
    %48 = math.log %cst_31 : f32
    %49 = vector.broadcast %48 : f32 to vector<8x2xf32>
    %50 = arith.subf %49, %24 : vector<8x2xf32>
    %51 = arith.subf %50, %47 : vector<8x2xf32>
    %cst_32 = arith.constant 2.000000e+00 : f32
    %52 = vector.broadcast %cst_32 : f32 to vector<8x2xf32>
    %53 = arith.mulf %52, %51 : vector<8x2xf32>
    %cst_33 = arith.constant dense<0.000000e+00> : vector<8xf32>
    %54 = vector.multi_reduction <add>, %53, %cst_33 [1] : vector<8x2xf32> to vector<8xf32>
    %55 = vector.shape_cast %54 : vector<8xf32> to vector<8x1xf32>
    %56 = arith.subf %37, %55 : vector<8x1xf32>
    %57 = math.tanh %24 : vector<8x2xf32>
    %cst_34 = arith.constant 1.000000e+00 : f32
    %58 = vector.broadcast %cst_34 : f32 to vector<8x2xf32>
    %59 = arith.mulf %58, %57 : vector<8x2xf32>
    %c0_35 = arith.constant 0 : index
    %c0_36 = arith.constant 0 : index
    %60 = vector.load %arg9[%c0_35, %c0_36] : memref<8x2xf32, #tpu.memory_space<vmem>>, vector<8x2xf32>
    tpu.vector_store %arg9[%c0_35, %c0_36], %59 {strides = array<i32>} : memref<8x2xf32, #tpu.memory_space<vmem>>, vector<8x2xf32>,
    %c0_37 = arith.constant 0 : index
    %c0_38 = arith.constant 0 : index
    %61 = vector.load %arg10[%c0_37, %c0_38] : memref<8x1xf32, #tpu.memory_space<vmem>>, vector<8x1xf32>
    tpu.vector_store %arg10[%c0_37, %c0_38], %56 {strides = array<i32>} : memref<8x1xf32, #tpu.memory_space<vmem>>, vector<8x1xf32>,
    return
  }
}

</mosaic_0001>

<bundles_post_ra>
// kernel: actor_forward.4
= control target key start
LH: loop header
LB: loop body
LE: loop exit
PB: predicated region body
PF: predicated region fallthrough
CT: control target
= control target key end

     0   :  { %s965_s12 = smov 0   ;;  %s967_s13 = smov 0   ;;  %s1341_s0 = inlined_call_operand.vmem [shape: f32[16,256], index: 0, kind: input, shape index: {}]   ;;  %s1342_s1 = inlined_call_operand.vmem [shape: f32[16,1], index: 1, kind: input, shape index: {}]   ;;  %s1343_s2 = inlined_call_operand.vmem [shape: f32[256,1152], index: 2, kind: input, shape index: {}]   ;;  %s1344_s3 = inlined_call_operand.vmem [shape: f32[16,1152], index: 3, kind: output, shape index: {}]  }
   0x1   :  { %s969_s14 = smov 0  }
   0x2 LB: > { %s746_s15 = sadd.s32 4294967295, %s942_s14   ;;  %s982_s16 = sadd.s32 1, %s942_s14   ;;  %s942_s14 = sphi %s969_s14, %s1348_s14   ;;  %s938_s13 = sphi %s967_s13, %s1347_s13   ;;  %s934_s12 = sphi %s965_s12, %s1346_s12  }
   0x3   : > { %s59_s17 = ssub.s32 %s942_s14, %s982_s16  ;;  %s62_s18 = sadd.s32 1, %s938_s13 }
   0x4   : > { %p60_p0 = scmp.eq.s32.totalorder %s59_s17, 0  ;;  %p69_p1 = scmp.ne.s32.totalorder %s938_s13, %s934_s12 }
   0x5   : > { %p70_p2 = scmp.eq.s32.totalorder %s942_s14, 0  ;;  %p99_p3 = scmp.eq.s32.totalorder %s746_s15, 2 }
   0x6   : > { %s993_s19 = scalar_select %p60_p0, %s938_s13, %s62_s18  }
   0x7   : > { %p71_p4 = por %p70_p2, %p69_p1  ;;  %p995_p5 = por %p99_p3, %p69_p1 }
   0x8   : > { %p749_p6 = scmp.ge.s32.totalorder %s942_s14, 3 }
   0xa   : > { %127 = sbr.rel (%p749_p6) target bundleno = 70 (0x46), region = 24 }
  0x11   : > { %130 = sbr.rel (!%p71_p4) target bundleno = 70 (0x46), region = 28  ;;  %s132_s21 = sand.u32 (%p71_p4), 1, %s938_s13  }
  0x12   : > { %s755_s22 = smul.u32 (%p71_p4), 24, %s942_s14 }
  0x13   : > { %s891_s23 = smul.u32 (%p71_p4), 768, %s132_s21 }
  0x14   : > { %s1005_s26 = scalar_lea.vmem (%p71_p4), %s1343_s2, %s755_s22 }
  0x15   : > { %v150_v0 = vld [vmem:[%s1005_s26] sm:$0xff] (%p71_p4)  ;;  %v152_v1 = vld [vmem:[%s1005_s26 + $0x8] sm:$0xff] (%p71_p4)  ;;  %v154_v2 = vld [vmem:[%s1005_s26 + $0x10] sm:$0xff] (%p71_p4)  ;;  %s1010_s27 = scalar_lea.vmem (%p71_p4), [#allocation2], %s891_s23 }
  0x16   : > { %151 = vst [vmem:[%s1010_s27] sm:$0xff] (%p71_p4), %v150_v0  ;;  %153 = vst [vmem:[%s1010_s27 + $0x8] sm:$0xff] (%p71_p4), %v152_v1  ;;  %v156_v3 = vld [vmem:[%s1005_s26 + $0x48] sm:$0xff] (%p71_p4)  ;;  %v158_v4 = vld [vmem:[%s1005_s26 + $0x50] sm:$0xff] (%p71_p4) }
  0x17   : > { %155 = vst [vmem:[%s1010_s27 + $0x10] sm:$0xff] (%p71_p4), %v154_v2  ;;  %v160_v5 = vld [vmem:[%s1005_s26 + $0x58] sm:$0xff] (%p71_p4)  ;;  %157 = vst [vmem:[%s1010_s27 + $0x18] sm:$0xff] (%p71_p4), %v156_v3  ;;  %v162_v6 = vld [vmem:[%s1005_s26 + $0x90] sm:$0xff] (%p71_p4) }
  0x18   : > { %159 = vst [vmem:[%s1010_s27 + $0x20] sm:$0xff] %v158_v4  ;;  %161 = vst [vmem:[%s1010_s27 + $0x28] sm:$0xff] %v160_v5  ;;  %v164_v7 = vld [vmem:[%s1005_s26 + $0x98] sm:$0xff]  ;;  %v166_v8 = vld [vmem:[%s1005_s26 + $0xa0] sm:$0xff] }
  0x19   : > { %163 = vst [vmem:[%s1010_s27 + $0x30] sm:$0xff] %v162_v6  ;;  %165 = vst [vmem:[%s1010_s27 + $0x38] sm:$0xff] %v164_v7  ;;  %v168_v9 = vld [vmem:[%s1005_s26 + $0xd8] sm:$0xff]  ;;  %v170_v10 = vld [vmem:[%s1005_s26 + $0xe0] sm:$0xff] }
  0x1a   : > { %167 = vst [vmem:[%s1010_s27 + $0x40] sm:$0xff] %v166_v8  ;;  %v172_v11 = vld [vmem:[%s1005_s26 + $0xe8] sm:$0xff]  ;;  %169 = vst [vmem:[%s1010_s27 + $0x48] sm:$0xff] %v168_v9  ;;  %v174_v12 = vld [vmem:[%s1005_s26 + $0x120] sm:$0xff] }
  0x1b   : > { %171 = vst [vmem:[%s1010_s27 + $0x50] sm:$0xff] %v170_v10  ;;  %173 = vst [vmem:[%s1010_s27 + $0x58] sm:$0xff] %v172_v11  ;;  %v176_v13 = vld [vmem:[%s1005_s26 + $0x128] sm:$0xff]  ;;  %v178_v14 = vld [vmem:[%s1005_s26 + $0x130] sm:$0xff] }
  0x1c   : > { %175 = vst [vmem:[%s1010_s27 + $0x60] sm:$0xff] %v174_v12  ;;  %177 = vst [vmem:[%s1010_s27 + $0x68] sm:$0xff] %v176_v13  ;;  %v180_v15 = vld [vmem:[%s1005_s26 + $0x168] sm:$0xff]  ;;  %v182_v16 = vld [vmem:[%s1005_s26 + $0x170] sm:$0xff] }
  0x1d   : > { %179 = vst [vmem:[%s1010_s27 + $0x70] sm:$0xff] %v178_v14  ;;  %v184_v17 = vld [vmem:[%s1005_s26 + $0x178] sm:$0xff]  ;;  %181 = vst [vmem:[%s1010_s27 + $0x78] sm:$0xff] %v180_v15  ;;  %v186_v18 = vld [vmem:[%s1005_s26 + $0x1b0] sm:$0xff] }
  0x1e   : > { %183 = vst [vmem:[%s1010_s27 + $0x80] sm:$0xff] %v182_v16  ;;  %185 = vst [vmem:[%s1010_s27 + $0x88] sm:$0xff] %v184_v17  ;;  %v188_v19 = vld [vmem:[%s1005_s26 + $0x1b8] sm:$0xff]  ;;  %v190_v20 = vld [vmem:[%s1005_s26 + $0x1c0] sm:$0xff] }
  0x1f   : > { %187 = vst [vmem:[%s1010_s27 + $0x90] sm:$0xff] %v186_v18  ;;  %189 = vst [vmem:[%s1010_s27 + $0x98] sm:$0xff] %v188_v19  ;;  %v192_v21 = vld [vmem:[%s1005_s26 + $0x1f8] sm:$0xff]  ;;  %v194_v22 = vld [vmem:[%s1005_s26 + $0x200] sm:$0xff] }
  0x20   : > { %191 = vst [vmem:[%s1010_s27 + $0xa0] sm:$0xff] %v190_v20  ;;  %v196_v23 = vld [vmem:[%s1005_s26 + $0x208] sm:$0xff]  ;;  %193 = vst [vmem:[%s1010_s27 + $0xa8] sm:$0xff] %v192_v21  ;;  %v198_v24 = vld [vmem:[%s1005_s26 + $0x240] sm:$0xff] }
  0x21   : > { %195 = vst [vmem:[%s1010_s27 + $0xb0] sm:$0xff] %v194_v22  ;;  %197 = vst [vmem:[%s1010_s27 + $0xb8] sm:$0xff] %v196_v23  ;;  %v200_v25 = vld [vmem:[%s1005_s26 + $0x248] sm:$0xff]  ;;  %v202_v26 = vld [vmem:[%s1005_s26 + $0x250] sm:$0xff] }
  0x22   : > { %199 = vst [vmem:[%s1010_s27 + $0xc0] sm:$0xff] %v198_v24  ;;  %201 = vst [vmem:[%s1010_s27 + $0xc8] sm:$0xff] %v200_v25  ;;  %v204_v27 = vld [vmem:[%s1005_s26 + $0x288] sm:$0xff]  ;;  %v206_v28 = vld [vmem:[%s1005_s26 + $0x290] sm:$0xff] }
  0x23   : > { %203 = vst [vmem:[%s1010_s27 + $0xd0] sm:$0xff] %v202_v26  ;;  %v208_v29 = vld [vmem:[%s1005_s26 + $0x298] sm:$0xff]  ;;  %205 = vst [vmem:[%s1010_s27 + $0xd8] sm:$0xff] %v204_v27  ;;  %v210_v30 = vld [vmem:[%s1005_s26 + $0x2d0] sm:$0xff] }
  0x24   : > { %207 = vst [vmem:[%s1010_s27 + $0xe0] sm:$0xff] %v206_v28  ;;  %209 = vst [vmem:[%s1010_s27 + $0xe8] sm:$0xff] %v208_v29  ;;  %v212_v31 = vld [vmem:[%s1005_s26 + $0x2d8] sm:$0xff]  ;;  %v214_v32 = vld [vmem:[%s1005_s26 + $0x2e0] sm:$0xff] }
  0x25   : > { %211 = vst [vmem:[%s1010_s27 + $0xf0] sm:$0xff] %v210_v30  ;;  %213 = vst [vmem:[%s1010_s27 + $0xf8] sm:$0xff] %v212_v31  ;;  %v216_v33 = vld [vmem:[%s1005_s26 + $0x318] sm:$0xff]  ;;  %v218_v34 = vld [vmem:[%s1005_s26 + $0x320] sm:$0xff] }
  0x26   : > { %215 = vst [vmem:[%s1010_s27 + $0x100] sm:$0xff] %v214_v32  ;;  %v220_v35 = vld [vmem:[%s1005_s26 + $0x328] sm:$0xff]  ;;  %217 = vst [vmem:[%s1010_s27 + $0x108] sm:$0xff] %v216_v33  ;;  %v222_v36 = vld [vmem:[%s1005_s26 + $0x360] sm:$0xff] }
  0x27   : > { %219 = vst [vmem:[%s1010_s27 + $0x110] sm:$0xff] %v218_v34  ;;  %221 = vst [vmem:[%s1010_s27 + $0x118] sm:$0xff] %v220_v35  ;;  %v224_v37 = vld [vmem:[%s1005_s26 + $0x368] sm:$0xff]  ;;  %v226_v38 = vld [vmem:[%s1005_s26 + $0x370] sm:$0xff] }
  0x28   : > { %223 = vst [vmem:[%s1010_s27 + $0x120] sm:$0xff] %v222_v36  ;;  %225 = vst [vmem:[%s1010_s27 + $0x128] sm:$0xff] %v224_v37  ;;  %v228_v39 = vld [vmem:[%s1005_s26 + $0x3a8] sm:$0xff]  ;;  %v230_v40 = vld [vmem:[%s1005_s26 + $0x3b0] sm:$0xff] }
  0x29   : > { %227 = vst [vmem:[%s1010_s27 + $0x130] sm:$0xff] %v226_v38  ;;  %v232_v41 = vld [vmem:[%s1005_s26 + $0x3b8] sm:$0xff]  ;;  %229 = vst [vmem:[%s1010_s27 + $0x138] sm:$0xff] %v228_v39  ;;  %v234_v42 = vld [vmem:[%s1005_s26 + $0x3f0] sm:$0xff] }
  0x2a   : > { %231 = vst [vmem:[%s1010_s27 + $0x140] sm:$0xff] %v230_v40  ;;  %233 = vst [vmem:[%s1010_s27 + $0x148] sm:$0xff] %v232_v41  ;;  %v236_v43 = vld [vmem:[%s1005_s26 + $0x3f8] sm:$0xff]  ;;  %v238_v44 = vld [vmem:[%s1005_s26 + $0x400] sm:$0xff] }
  0x2b   : > { %235 = vst [vmem:[%s1010_s27 + $0x150] sm:$0xff] %v234_v42  ;;  %237 = vst [vmem:[%s1010_s27 + $0x158] sm:$0xff] %v236_v43  ;;  %v240_v45 = vld [vmem:[%s1005_s26 + $0x438] sm:$0xff]  ;;  %v242_v46 = vld [vmem:[%s1005_s26 + $0x440] sm:$0xff] }
  0x2c   : > { %239 = vst [vmem:[%s1010_s27 + $0x160] sm:$0xff] %v238_v44  ;;  %v244_v47 = vld [vmem:[%s1005_s26 + $0x448] sm:$0xff]  ;;  %241 = vst [vmem:[%s1010_s27 + $0x168] sm:$0xff] %v240_v45  ;;  %v246_v48 = vld [vmem:[%s1005_s26 + $0x480] sm:$0xff] }
  0x2d   : > { %243 = vst [vmem:[%s1010_s27 + $0x170] sm:$0xff] %v242_v46  ;;  %245 = vst [vmem:[%s1010_s27 + $0x178] sm:$0xff] %v244_v47  ;;  %v248_v49 = vld [vmem:[%s1005_s26 + $0x488] sm:$0xff]  ;;  %v250_v50 = vld [vmem:[%s1005_s26 + $0x490] sm:$0xff] }
  0x2e   : > { %247 = vst [vmem:[%s1010_s27 + $0x180] sm:$0xff] %v246_v48  ;;  %249 = vst [vmem:[%s1010_s27 + $0x188] sm:$0xff] %v248_v49  ;;  %v252_v51 = vld [vmem:[%s1005_s26 + $0x4c8] sm:$0xff]  ;;  %v254_v52 = vld [vmem:[%s1005_s26 + $0x4d0] sm:$0xff] }
  0x2f   : > { %251 = vst [vmem:[%s1010_s27 + $0x190] sm:$0xff] %v250_v50  ;;  %v256_v53 = vld [vmem:[%s1005_s26 + $0x4d8] sm:$0xff]  ;;  %253 = vst [vmem:[%s1010_s27 + $0x198] sm:$0xff] %v252_v51  ;;  %v258_v54 = vld [vmem:[%s1005_s26 + $0x510] sm:$0xff] }
  0x30   : > { %255 = vst [vmem:[%s1010_s27 + $0x1a0] sm:$0xff] %v254_v52  ;;  %257 = vst [vmem:[%s1010_s27 + $0x1a8] sm:$0xff] %v256_v53  ;;  %v260_v55 = vld [vmem:[%s1005_s26 + $0x518] sm:$0xff]  ;;  %v262_v56 = vld [vmem:[%s1005_s26 + $0x520] sm:$0xff] }
  0x31   : > { %259 = vst [vmem:[%s1010_s27 + $0x1b0] sm:$0xff] %v258_v54  ;;  %261 = vst [vmem:[%s1010_s27 + $0x1b8] sm:$0xff] %v260_v55  ;;  %v264_v57 = vld [vmem:[%s1005_s26 + $0x558] sm:$0xff]  ;;  %v266_v58 = vld [vmem:[%s1005_s26 + $0x560] sm:$0xff] }
  0x32   : > { %263 = vst [vmem:[%s1010_s27 + $0x1c0] sm:$0xff] %v262_v56  ;;  %v268_v59 = vld [vmem:[%s1005_s26 + $0x568] sm:$0xff]  ;;  %265 = vst [vmem:[%s1010_s27 + $0x1c8] sm:$0xff] %v264_v57  ;;  %v270_v60 = vld [vmem:[%s1005_s26 + $0x5a0] sm:$0xff] }
  0x33   : > { %267 = vst [vmem:[%s1010_s27 + $0x1d0] sm:$0xff] %v266_v58  ;;  %269 = vst [vmem:[%s1010_s27 + $0x1d8] sm:$0xff] %v268_v59  ;;  %v272_v61 = vld [vmem:[%s1005_s26 + $0x5a8] sm:$0xff]  ;;  %v274_v62 = vld [vmem:[%s1005_s26 + $0x5b0] sm:$0xff] }
  0x34   : > { %271 = vst [vmem:[%s1010_s27 + $0x1e0] sm:$0xff] %v270_v60  ;;  %273 = vst [vmem:[%s1010_s27 + $0x1e8] sm:$0xff] %v272_v61  ;;  %v276_v63 = vld [vmem:[%s1005_s26 + $0x5e8] sm:$0xff]  ;;  %v278_v0 = vld [vmem:[%s1005_s26 + $0x5f0] sm:$0xff] }
  0x35   : > { %275 = vst [vmem:[%s1010_s27 + $0x1f0] sm:$0xff] %v274_v62  ;;  %v280_v1 = vld [vmem:[%s1005_s26 + $0x5f8] sm:$0xff]  ;;  %277 = vst [vmem:[%s1010_s27 + $0x1f8] sm:$0xff] %v276_v63  ;;  %v282_v2 = vld [vmem:[%s1005_s26 + $0x630] sm:$0xff] }
  0x36   : > { %279 = vst [vmem:[%s1010_s27 + $0x200] sm:$0xff] %v278_v0  ;;  %281 = vst [vmem:[%s1010_s27 + $0x208] sm:$0xff] %v280_v1  ;;  %v284_v3 = vld [vmem:[%s1005_s26 + $0x638] sm:$0xff]  ;;  %v286_v4 = vld [vmem:[%s1005_s26 + $0x640] sm:$0xff] }
  0x37   : > { %283 = vst [vmem:[%s1010_s27 + $0x210] sm:$0xff] %v282_v2  ;;  %285 = vst [vmem:[%s1010_s27 + $0x218] sm:$0xff] %v284_v3  ;;  %v288_v5 = vld [vmem:[%s1005_s26 + $0x678] sm:$0xff]  ;;  %v290_v6 = vld [vmem:[%s1005_s26 + $0x680] sm:$0xff] }
  0x38   : > { %287 = vst [vmem:[%s1010_s27 + $0x220] sm:$0xff] %v286_v4  ;;  %v292_v7 = vld [vmem:[%s1005_s26 + $0x688] sm:$0xff]  ;;  %289 = vst [vmem:[%s1010_s27 + $0x228] sm:$0xff] %v288_v5  ;;  %v294_v8 = vld [vmem:[%s1005_s26 + $0x6c0] sm:$0xff] }
  0x39   : > { %291 = vst [vmem:[%s1010_s27 + $0x230] sm:$0xff] %v290_v6  ;;  %293 = vst [vmem:[%s1010_s27 + $0x238] sm:$0xff] %v292_v7  ;;  %v296_v9 = vld [vmem:[%s1005_s26 + $0x6c8] sm:$0xff]  ;;  %v298_v10 = vld [vmem:[%s1005_s26 + $0x6d0] sm:$0xff] }
  0x3a   : > { %295 = vst [vmem:[%s1010_s27 + $0x240] sm:$0xff] %v294_v8  ;;  %297 = vst [vmem:[%s1010_s27 + $0x248] sm:$0xff] %v296_v9  ;;  %v300_v11 = vld [vmem:[%s1005_s26 + $0x708] sm:$0xff]  ;;  %v302_v12 = vld [vmem:[%s1005_s26 + $0x710] sm:$0xff] }
  0x3b   : > { %299 = vst [vmem:[%s1010_s27 + $0x250] sm:$0xff] %v298_v10  ;;  %v304_v13 = vld [vmem:[%s1005_s26 + $0x718] sm:$0xff]  ;;  %301 = vst [vmem:[%s1010_s27 + $0x258] sm:$0xff] %v300_v11  ;;  %v306_v14 = vld [vmem:[%s1005_s26 + $0x750] sm:$0xff] }
  0x3c   : > { %303 = vst [vmem:[%s1010_s27 + $0x260] sm:$0xff] %v302_v12  ;;  %305 = vst [vmem:[%s1010_s27 + $0x268] sm:$0xff] %v304_v13  ;;  %v308_v15 = vld [vmem:[%s1005_s26 + $0x758] sm:$0xff]  ;;  %v310_v16 = vld [vmem:[%s1005_s26 + $0x760] sm:$0xff] }
  0x3d   : > { %307 = vst [vmem:[%s1010_s27 + $0x270] sm:$0xff] %v306_v14  ;;  %309 = vst [vmem:[%s1010_s27 + $0x278] sm:$0xff] %v308_v15  ;;  %v312_v17 = vld [vmem:[%s1005_s26 + $0x798] sm:$0xff]  ;;  %v314_v18 = vld [vmem:[%s1005_s26 + $0x7a0] sm:$0xff] }
  0x3e   : > { %311 = vst [vmem:[%s1010_s27 + $0x280] sm:$0xff] %v310_v16  ;;  %v316_v19 = vld [vmem:[%s1005_s26 + $0x7a8] sm:$0xff]  ;;  %313 = vst [vmem:[%s1010_s27 + $0x288] sm:$0xff] %v312_v17  ;;  %v318_v20 = vld [vmem:[%s1005_s26 + $0x7e0] sm:$0xff] }
  0x3f   : > { %315 = vst [vmem:[%s1010_s27 + $0x290] sm:$0xff] %v314_v18  ;;  %317 = vst [vmem:[%s1010_s27 + $0x298] sm:$0xff] %v316_v19  ;;  %v320_v21 = vld [vmem:[%s1005_s26 + $0x7e8] sm:$0xff]  ;;  %v322_v22 = vld [vmem:[%s1005_s26 + $0x7f0] sm:$0xff] }
  0x40   : > { %319 = vst [vmem:[%s1010_s27 + $0x2a0] sm:$0xff] %v318_v20  ;;  %321 = vst [vmem:[%s1010_s27 + $0x2a8] sm:$0xff] %v320_v21  ;;  %v324_v23 = vld [vmem:[%s1005_s26 + $0x828] sm:$0xff]  ;;  %v326_v24 = vld [vmem:[%s1005_s26 + $0x830] sm:$0xff] }
  0x41   : > { %323 = vst [vmem:[%s1010_s27 + $0x2b0] sm:$0xff] %v322_v22  ;;  %v328_v25 = vld [vmem:[%s1005_s26 + $0x838] sm:$0xff]  ;;  %325 = vst [vmem:[%s1010_s27 + $0x2b8] sm:$0xff] %v324_v23  ;;  %v330_v26 = vld [vmem:[%s1005_s26 + $0x870] sm:$0xff] }
  0x42   : > { %327 = vst [vmem:[%s1010_s27 + $0x2c0] sm:$0xff] %v326_v24  ;;  %329 = vst [vmem:[%s1010_s27 + $0x2c8] sm:$0xff] %v328_v25  ;;  %v332_v27 = vld [vmem:[%s1005_s26 + $0x878] sm:$0xff]  ;;  %v334_v28 = vld [vmem:[%s1005_s26 + $0x880] sm:$0xff] }
  0x43   : > { %331 = vst [vmem:[%s1010_s27 + $0x2d0] sm:$0xff] %v330_v26  ;;  %333 = vst [vmem:[%s1010_s27 + $0x2d8] sm:$0xff] %v332_v27  ;;  %v336_v29 = vld [vmem:[%s1005_s26 + $0x8b8] sm:$0xff]  ;;  %v338_v30 = vld [vmem:[%s1005_s26 + $0x8c0] sm:$0xff] }
  0x44   : > { %335 = vst [vmem:[%s1010_s27 + $0x2e0] sm:$0xff] %v334_v28  ;;  %v340_v31 = vld [vmem:[%s1005_s26 + $0x8c8] sm:$0xff]  ;;  %337 = vst [vmem:[%s1010_s27 + $0x2e8] sm:$0xff] %v336_v29 }
  0x45   : > { %339 = vst [vmem:[%s1010_s27 + $0x2f0] sm:$0xff] %v338_v30  ;;  %341 = vst [vmem:[%s1010_s27 + $0x2f8] sm:$0xff] %v340_v31 }
  0x46 PF: > { %p751_p7 = scmp.ge.s32.totalorder %s942_s14, 1  ;;  %p346_p8 = scmp.lt.s32.totalorder %s942_s14, 4 }
  0x48   : > { %p347_p9 = pnand %p751_p7, %p346_p8 }
  0x49   : > { %s353_s28 = sand.u32 (!%p347_p9), 1, %s934_s12   ;;  %v474_v32 = vld [vmem:[%s1341_s0 + $0x8] sm:$0xff] (!%p347_p9)  ;;  %v477_v33 = vld [vmem:[%s1342_s1] sm:$0xff] (!%p347_p9)  ;;  %v944_v34 = vmov (!%p347_p9), 0  }
  0x4a   : > { %350 = sbr.rel (%p347_p9) target bundleno = 375 (0x177), region = 51  ;;  %630 = vmatprep.mubr.f32.mxu1 (!%p347_p9), %v474_v32  ;;  %553 = vmatprep.mubr.f32.mxu0 (!%p347_p9), %v474_v32  ;;  %v478_v35 = vld [vmem:[%s1342_s1 + $0x8] sm:$0xff] (!%p347_p9) }
  0x4b   : > { %s892_s4 = smul.u32 (!%p347_p9), 768, %s353_s28  ;;  %919 = vset.pattern.permute.xlu0 (!%p347_p9), %v944_v34 }
  0x4c   : > { %481 = vperm.xlu0 (!%p347_p9), %919, %v477_v33   ;;  %s893_s23 = smul.u32 (!%p347_p9), 48, %s353_s28 }
  0x4d   : > { %s1215_s9 = scalar_lea.vmem (!%p347_p9), [#allocation2], %s892_s4 }
  0x4e   : > { %v378_v36 = vld [vmem:[%s1215_s9 + $0x8] sm:$0xff] (!%p347_p9)  ;;  %v381_v37 = vld [vmem:[%s1215_s9 + $0x20] sm:$0xff] (!%p347_p9)  ;;  %v380_v40 = vld [vmem:[%s1215_s9 + $0x18] sm:$0xff] (!%p347_p9)  ;;  %s374_s24 = scalar_lea.vmem (!%p347_p9), [#allocation3], %s893_s23 }
  0x4f   : > { %v377_v38 = vld [vmem:[%s1215_s9] sm:$0xff] (!%p347_p9)  ;;  %v795_v39 = vpack.c.bf16 (!%p347_p9), %v381_v37, %v378_v36  ;;  %v384_v41 = vld [vmem:[%s1215_s9 + $0x38] sm:$0xff] (!%p347_p9)  ;;  %v387_v42 = vld [vmem:[%s1215_s9 + $0x50] sm:$0xff] (!%p347_p9) }
  0x50   : > { %v797_v43 = vpack.c.bf16 (!%p347_p9), %v380_v40, %v377_v38  ;;  %v799_v44 = vpack.c.bf16 (!%p347_p9), %v387_v42, %v384_v41  ;;  %v383_v45 = vld [vmem:[%s1215_s9 + $0x30] sm:$0xff] (!%p347_p9)  ;;  %v386_v46 = vld [vmem:[%s1215_s9 + $0x48] sm:$0xff] (!%p347_p9)  ;;  %v393_v48 = vld [vmem:[%s1215_s9 + $0x80] sm:$0xff] (!%p347_p9)  ;;  %486 = vperm.xlu0 (!%p347_p9), %919, %v478_v35  }
  0x51   : > { %v390_v47 = vld [vmem:[%s1215_s9 + $0x68] sm:$0xff]  ;;  %796 = vmatprep.subr.bf16.mxu0 %v795_v39  ;;  %v801_v49 = vpack.c.bf16 %v386_v46, %v383_v45  ;;  %v389_v51 = vld [vmem:[%s1215_s9 + $0x60] sm:$0xff]  ;;  %v392_v52 = vld [vmem:[%s1215_s9 + $0x78] sm:$0xff]  ;;  %s756_s12 = smul.u32 (%p995_p5), 24, %s746_s15 }
  0x52   : > { %798 = vmatpush1.bf16.msra.mxu0 %v797_v43  ;;  %v803_v50 = vpack.c.bf16 %v393_v48, %v390_v47  ;;  %v396_v53 = vld [vmem:[%s1215_s9 + $0x98] sm:$0xff]  ;;  %v399_v54 = vld [vmem:[%s1215_s9 + $0xb0] sm:$0xff]  ;;  %v805_v55 = vpack.c.bf16 %v392_v52, %v389_v51  ;;  %v398_v57 = vld [vmem:[%s1215_s9 + $0xa8] sm:$0xff] }
  0x53   : > { %800 = vmatprep.subr.bf16.mxu0 %v799_v44  ;;  %v395_v56 = vld [vmem:[%s1215_s9 + $0x90] sm:$0xff]  ;;  %v807_v58 = vpack.c.bf16 %v399_v54, %v396_v53  ;;  %v402_v59 = vld [vmem:[%s1215_s9 + $0xc8] sm:$0xff]  ;;  %v405_v62 = vld [vmem:[%s1215_s9 + $0xe0] sm:$0xff]  ;;  %s662_s27 = scalar_lea.vmem (%p995_p5), %s1344_s3, %s756_s12 }
  0x54   : > { %v427_v60 = vld [vmem:[%s1215_s9 + $0x190] sm:$0xff]  ;;  %v430_v61 = vld [vmem:[%s1215_s9 + $0x1a8] sm:$0xff]  ;;  %v809_v3 = vpack.c.bf16 %v398_v57, %v395_v56  ;;  %v433_v4 = vld [vmem:[%s1215_s9 + $0x1c0] sm:$0xff]  ;;  %v811_v7 = vpack.c.bf16 %v405_v62, %v402_v59 }
  0x55   : > { %v859_v63 = vpack.c.bf16 %v430_v61, %v427_v60  ;;  %v379_v0 = vld [vmem:[%s1215_s9 + $0x10] sm:$0xff]  ;;  %v382_v1 = vld [vmem:[%s1215_s9 + $0x28] sm:$0xff]  ;;  %v436_v5 = vld [vmem:[%s1215_s9 + $0x1d8] sm:$0xff] }
  0x56   : > { %802 = vmatpush1.bf16.msra.mxu0 %v801_v49  ;;  %v861_v2 = vpack.c.bf16 %v382_v1, %v379_v0  ;;  %v385_v6 = vld [vmem:[%s1215_s9 + $0x40] sm:$0xff]  ;;  %v404_v9 = vld [vmem:[%s1215_s9 + $0xd8] sm:$0xff]  ;;  %v863_v10 = vpack.c.bf16 %v436_v5, %v433_v4  ;;  %v411_v13 = vld [vmem:[%s1215_s9 + $0x110] sm:$0xff] }
  0x57   : > { %804 = vmatprep.subr.bf16.mxu0 %v803_v50  ;;  %860 = vmatprep.subr.bf16.mxu1 %v859_v63  ;;  %v401_v8 = vld [vmem:[%s1215_s9 + $0xc0] sm:$0xff]  ;;  %v388_v11 = vld [vmem:[%s1215_s9 + $0x58] sm:$0xff]  ;;  %v439_v15 = vld [vmem:[%s1215_s9 + $0x1f0] sm:$0xff] }
  0x58   : > { %862 = vmatpush3.bf16.msra.mxu1 %v861_v2  ;;  %v408_v12 = vld [vmem:[%s1215_s9 + $0xf8] sm:$0xff]  ;;  %v865_v14 = vpack.c.bf16 %v388_v11, %v385_v6  ;;  %v442_v16 = vld [vmem:[%s1215_s9 + $0x208] sm:$0xff]  ;;  %v391_v17 = vld [vmem:[%s1215_s9 + $0x70] sm:$0xff]  ;;  %v813_v19 = vpack.c.bf16 %v404_v9, %v401_v8 }
  0x59   : > { %864 = vmatprep.subr.bf16.mxu1 %v863_v10  ;;  %v394_v18 = vld [vmem:[%s1215_s9 + $0x88] sm:$0xff]  ;;  %v407_v20 = vld [vmem:[%s1215_s9 + $0xf0] sm:$0xff]  ;;  %v867_v22 = vpack.c.bf16 %v442_v16, %v439_v15  ;;  %v815_v23 = vpack.c.bf16 %v411_v13, %v408_v12  ;;  %v445_v26 = vld [vmem:[%s1215_s9 + $0x220] sm:$0xff] }
  0x5a   : > { %806 = vmatpush1.bf16.msra.mxu0 %v805_v55  ;;  %v410_v21 = vld [vmem:[%s1215_s9 + $0x108] sm:$0xff]  ;;  %v869_v25 = vpack.c.bf16 %v394_v18, %v391_v17  ;;  %v448_v27 = vld [vmem:[%s1215_s9 + $0x238] sm:$0xff]  ;;  %v417_v28 = vld [vmem:[%s1215_s9 + $0x140] sm:$0xff] }
  0x5b   : > { %808 = vmatprep.subr.bf16.mxu0 %v807_v58  ;;  %v414_v24 = vld [vmem:[%s1215_s9 + $0x128] sm:$0xff]  ;;  %v871_v29 = vpack.c.bf16 %v448_v27, %v445_v26  ;;  %v397_v30 = vld [vmem:[%s1215_s9 + $0xa0] sm:$0xff]  ;;  %v400_v31 = vld [vmem:[%s1215_s9 + $0xb8] sm:$0xff]  ;;  %v817_v32 = vpack.c.bf16 %v410_v21, %v407_v20 }
  0x5c   : > { %866 = vmatpush3.bf16.msra.mxu1 %v865_v14  ;;  %v451_v33 = vld [vmem:[%s1215_s9 + $0x250] sm:$0xff]  ;;  %v454_v34 = vld [vmem:[%s1215_s9 + $0x268] sm:$0xff]  ;;  %v819_v35 = vpack.c.bf16 %v417_v28, %v414_v24  ;;  %v413_v36 = vld [vmem:[%s1215_s9 + $0x120] sm:$0xff]  ;;  %v873_v39 = vpack.c.bf16 %v400_v31, %v397_v30 }
  0x5d   : > { %868 = vmatprep.subr.bf16.mxu1 %v867_v22  ;;  %v416_v37 = vld [vmem:[%s1215_s9 + $0x138] sm:$0xff]  ;;  %v423_v40 = vld [vmem:[%s1215_s9 + $0x170] sm:$0xff]  ;;  %v875_v41 = vpack.c.bf16 %v454_v34, %v451_v33  ;;  %v406_v43 = vld [vmem:[%s1215_s9 + $0xe8] sm:$0xff] }
  0x5e   : > { %810 = vmatpush1.bf16.msra.mxu0 %v809_v3  ;;  %v420_v38 = vld [vmem:[%s1215_s9 + $0x158] sm:$0xff]  ;;  %v403_v42 = vld [vmem:[%s1215_s9 + $0xd0] sm:$0xff]  ;;  %v457_v44 = vld [vmem:[%s1215_s9 + $0x280] sm:$0xff]  ;;  %v821_v46 = vpack.c.bf16 %v416_v37, %v413_v36 }
  0x5f   : > { %812 = vmatprep.subr.bf16.mxu0 %v811_v7  ;;  %v460_v45 = vld [vmem:[%s1215_s9 + $0x298] sm:$0xff]  ;;  %v823_v47 = vpack.c.bf16 %v423_v40, %v420_v38  ;;  %v419_v48 = vld [vmem:[%s1215_s9 + $0x150] sm:$0xff]  ;;  %v422_v49 = vld [vmem:[%s1215_s9 + $0x168] sm:$0xff]  ;;  %v877_v51 = vpack.c.bf16 %v406_v43, %v403_v42 }
  0x60   : > { %870 = vmatpush3.bf16.msra.mxu1 %v869_v25  ;;  %v426_v50 = vld [vmem:[%s1215_s9 + $0x188] sm:$0xff]  ;;  %v429_v52 = vld [vmem:[%s1215_s9 + $0x1a0] sm:$0xff]  ;;  %v879_v53 = vpack.c.bf16 %v460_v45, %v457_v44  ;;  %v412_v55 = vld [vmem:[%s1215_s9 + $0x118] sm:$0xff]  ;;  %v825_v58 = vpack.c.bf16 %v422_v49, %v419_v48 }
  0x61   : > { %872 = vmatprep.subr.bf16.mxu1 %v871_v29  ;;  %v409_v54 = vld [vmem:[%s1215_s9 + $0x100] sm:$0xff]  ;;  %v463_v56 = vld [vmem:[%s1215_s9 + $0x2b0] sm:$0xff]  ;;  %v466_v57 = vld [vmem:[%s1215_s9 + $0x2c8] sm:$0xff]  ;;  %v827_v59 = vpack.c.bf16 %v429_v52, %v426_v50 }
  0x62   : > { %814 = vmatpush1.bf16.msra.mxu0 %v813_v19  ;;  %v425_v60 = vld [vmem:[%s1215_s9 + $0x180] sm:$0xff]  ;;  %v428_v61 = vld [vmem:[%s1215_s9 + $0x198] sm:$0xff]  ;;  %v881_v63 = vpack.c.bf16 %v412_v55, %v409_v54  ;;  %v435_v0 = vld [vmem:[%s1215_s9 + $0x1d0] sm:$0xff]  ;;  %v883_v1 = vpack.c.bf16 %v466_v57, %v463_v56 }
  0x63   : > { %816 = vmatprep.subr.bf16.mxu0 %v815_v23  ;;  %v432_v62 = vld [vmem:[%s1215_s9 + $0x1b8] sm:$0xff]  ;;  %v415_v2 = vld [vmem:[%s1215_s9 + $0x130] sm:$0xff]  ;;  %v418_v3 = vld [vmem:[%s1215_s9 + $0x148] sm:$0xff]  ;;  %v829_v6 = vpack.c.bf16 %v428_v61, %v425_v60 }
  0x64   : > { %874 = vmatpush3.bf16.msra.mxu1 %v873_v39  ;;  %v469_v4 = vld [vmem:[%s1215_s9 + $0x2e0] sm:$0xff]  ;;  %v472_v5 = vld [vmem:[%s1215_s9 + $0x2f8] sm:$0xff]  ;;  %v831_v7 = vpack.c.bf16 %v435_v0, %v432_v62  ;;  %v431_v8 = vld [vmem:[%s1215_s9 + $0x1b0] sm:$0xff]  ;;  %v885_v11 = vpack.c.bf16 %v418_v3, %v415_v2 }
  0x65   : > { %876 = vmatprep.subr.bf16.mxu1 %v875_v41  ;;  %v434_v9 = vld [vmem:[%s1215_s9 + $0x1c8] sm:$0xff]  ;;  %v441_v12 = vld [vmem:[%s1215_s9 + $0x200] sm:$0xff]  ;;  %v887_v13 = vpack.c.bf16 %v472_v5, %v469_v4  ;;  %v424_v15 = vld [vmem:[%s1215_s9 + $0x178] sm:$0xff] }
  0x66   : > { %818 = vmatpush1.bf16.msra.mxu0 %v817_v32  ;;  %v438_v10 = vld [vmem:[%s1215_s9 + $0x1e8] sm:$0xff]  ;;  %v421_v14 = vld [vmem:[%s1215_s9 + $0x160] sm:$0xff]  ;;  %v833_v16 = vpack.c.bf16 %v434_v9, %v431_v8  ;;  %v440_v19 = vld [vmem:[%s1215_s9 + $0x1f8] sm:$0xff] }
  0x67   : > { %820 = vmatprep.subr.bf16.mxu0 %v819_v35  ;;  %v835_v17 = vpack.c.bf16 %v441_v12, %v438_v10  ;;  %v437_v18 = vld [vmem:[%s1215_s9 + $0x1e0] sm:$0xff]  ;;  %v889_v20 = vpack.c.bf16 %v424_v15, %v421_v14  ;;  %v444_v21 = vld [vmem:[%s1215_s9 + $0x218] sm:$0xff]  ;;  %v447_v22 = vld [vmem:[%s1215_s9 + $0x230] sm:$0xff] }
  0x68   : > { %878 = vmatpush3.bf16.msra.mxu1 %v877_v51  ;;  %v837_v23 = vpack.c.bf16 %v440_v19, %v437_v18  ;;  %v839_v24 = vpack.c.bf16 %v447_v22, %v444_v21  ;;  %v443_v25 = vld [vmem:[%s1215_s9 + $0x210] sm:$0xff]  ;;  %v446_v26 = vld [vmem:[%s1215_s9 + $0x228] sm:$0xff]  ;;  %v473_v27 = vld [vmem:[%s1341_s0] sm:$0xff] }
  0x69   : > { %880 = vmatprep.subr.bf16.mxu1 %v879_v53  ;;  %v450_v28 = vld [vmem:[%s1215_s9 + $0x248] sm:$0xff]  ;;  %v453_v29 = vld [vmem:[%s1215_s9 + $0x260] sm:$0xff]  ;;  %v476_v30 = vld [vmem:[%s1341_s0 + $0x18] sm:$0xff]  ;;  %v841_v31 = vpack.c.bf16 %v446_v26, %v443_v25 }
  0x6a   : > { %822 = vmatpush1.bf16.msra.mxu0 %v821_v46  ;;  %v843_v32 = vpack.c.bf16 %v453_v29, %v450_v28  ;;  %v449_v33 = vld [vmem:[%s1215_s9 + $0x240] sm:$0xff]  ;;  %v452_v34 = vld [vmem:[%s1215_s9 + $0x258] sm:$0xff]  ;;  %v475_v35 = vld [vmem:[%s1341_s0 + $0x10] sm:$0xff] }
  0x6b   : > { %824 = vmatprep.subr.bf16.mxu0 %v823_v47  ;;  %v456_v36 = vld [vmem:[%s1215_s9 + $0x278] sm:$0xff]  ;;  %v459_v37 = vld [vmem:[%s1215_s9 + $0x290] sm:$0xff]  ;;  %v845_v38 = vpack.c.bf16 %v452_v34, %v449_v33  ;;  %v458_v41 = vld [vmem:[%s1215_s9 + $0x288] sm:$0xff] }
  0x6c   : > { %882 = vmatpush3.bf16.msra.mxu1 %v881_v63  ;;  %v847_v39 = vpack.c.bf16 %v459_v37, %v456_v36  ;;  %v455_v40 = vld [vmem:[%s1215_s9 + $0x270] sm:$0xff]  ;;  %v462_v42 = vld [vmem:[%s1215_s9 + $0x2a8] sm:$0xff]  ;;  %v465_v43 = vld [vmem:[%s1215_s9 + $0x2c0] sm:$0xff] }
  0x6d   : > { %884 = vmatprep.subr.bf16.mxu1 %v883_v1  ;;  %v849_v44 = vpack.c.bf16 %v458_v41, %v455_v40  ;;  %v851_v45 = vpack.c.bf16 %v465_v43, %v462_v42  ;;  %v461_v46 = vld [vmem:[%s1215_s9 + $0x2a0] sm:$0xff]  ;;  %v464_v47 = vld [vmem:[%s1215_s9 + $0x2b8] sm:$0xff]  ;;  %v471_v49 = vld [vmem:[%s1215_s9 + $0x2f0] sm:$0xff] }
  0x6e   : > { %826 = vmatpush1.bf16.msra.mxu0 %v825_v58  ;;  %v468_v48 = vld [vmem:[%s1215_s9 + $0x2d8] sm:$0xff]  ;;  %v853_v50 = vpack.c.bf16 %v464_v47, %v461_v46  ;;  %v467_v52 = vld [vmem:[%s1215_s9 + $0x2d0] sm:$0xff]  ;;  %v470_v53 = vld [vmem:[%s1215_s9 + $0x2e8] sm:$0xff] }
  0x6f   : > { %828 = vmatprep.subr.bf16.mxu0 %v827_v59  ;;  %v855_v51 = vpack.c.bf16 %v471_v49, %v468_v48  ;;  %v857_v54 = vpack.c.bf16 %v470_v53, %v467_v52 }
  0x70   : > { %886 = vmatpush3.bf16.msra.mxu1 %v885_v11 }
  0x71   : > { %888 = vmatprep.subr.bf16.mxu1 %v887_v13 }
  0x72   : > { %830 = vmatpush1.bf16.msra.mxu0 %v829_v6 }
  0x73   : > { %832 = vmatprep.subr.bf16.mxu0 %v831_v7 }
  0x74   : > { %890 = vmatpush3.bf16.msra.mxu1 %v889_v20 }
  0x76   : > { %834 = vmatpush1.bf16.msra.mxu0 %v833_v16 }
  0x77   : > { %836 = vmatprep.subr.bf16.mxu0 %v835_v17  ;;  %631 = vmatmul.mubr.f32.vlgmr.msra.gmra.mrb[0].mxu1 %v473_v27 }
  0x78   : > { %635 = vmatprep.mubr.f32.mxu1 %v476_v30 }
  0x7a   : > { %838 = vmatpush1.bf16.msra.mxu0 %v837_v23 }
  0x7b   : > { %840 = vmatprep.subr.bf16.mxu0 %v839_v24  ;;  %636 = vmatmul.mubr.f32.gmra.mrb[2].mxu1 %v475_v35 }
  0x7e   : > { %842 = vmatpush1.bf16.msra.mxu0 %v841_v31 }
  0x7f   : > { %844 = vmatprep.subr.bf16.mxu0 %v843_v32 }
  0x82   : > { %846 = vmatpush1.bf16.msra.mxu0 %v845_v38 }
  0x83   : > { %848 = vmatprep.subr.bf16.mxu0 %v847_v39 }
  0x86   : > { %850 = vmatpush1.bf16.msra.mxu0 %v849_v44 }
  0x87   : > { %852 = vmatprep.subr.bf16.mxu0 %v851_v45 }
  0x8a   : > { %854 = vmatpush1.bf16.msra.mxu0 %v853_v50 }
  0x8b   : > { %856 = vmatprep.subr.bf16.mxu0 %v855_v51 }
  0x8e   : > { %858 = vmatpush1.bf16.msra.mxu0 %v857_v54 }
  0x91   : > { %554 = vmatmul.mubr.f32.vlgmr.msra.gmra.mrb[0].mxu0 %v473_v27 }
  0x92   : > { %559 = vmatprep.mubr.f32.mxu0 %v476_v30 }
  0x95   : > { %560 = vmatmul.mubr.f32.gmra.mrb[2].mxu0 %v475_v35 }
  0xcb   : > { %v482_v55 = vpop.permute.xlu0 %481 }
  0xcf   : > { %v487_v62 = vpop.permute.xlu0 %486 }
 0x14a   : > { %v789_v56 = vpop.f32.mrb[0].mxu1 }
 0x14b   : > { %v790_v57 = vpop.f32.mrb[1].mxu1 }
 0x14c   : > { %v791_v58 = vadd.f32 %v790_v57, %v789_v56 }
 0x14e   : > { %v633_v59 = vadd.f32 %v791_v58, %v482_v55  ;;  %v792_v60 = vpop.f32.mrb[2].mxu1 }
 0x14f   : > { %v793_v61 = vpop.f32.mrb[3].mxu1 }
 0x150   : > { %v643_v63 = vmax.f32 %v633_v59, 0.0  ;;  %v794_v0 = vadd.f32 %v793_v61, %v792_v60 }
 0x152   : > { %649 = vst [vmem:[%s374_s24 + $0x10] sm:$0xff] %v643_v63  ;;  %v638_v1 = vadd.f32 %v794_v0, %v487_v62 }
 0x154   : > { %v646_v2 = vmax.f32 %v638_v1, 0.0 }
 0x156   : > { %652 = vst [vmem:[%s374_s24 + $0x28] sm:$0xff] %v646_v2 }
 0x159   : > { %v679_v17 = vld [vmem:[%s374_s24 + $0x10] sm:$0xff] (%p995_p5) }
 0x15a   : > { %680 = vst [vmem:[%s662_s27 + $0x10] sm:$0xff] (%p995_p5), %v679_v17 }
 0x15d   : > { %v685_v20 = vld [vmem:[%s374_s24 + $0x28] sm:$0xff] (%p995_p5) }
 0x15e   : > { %686 = vst [vmem:[%s662_s27 + $0x58] sm:$0xff] (%p995_p5), %v685_v20 }
 0x164   : > { %v555_v3 = vpop.f32.mrb[0].mxu0 }
 0x165   : > { %v556_v4 = vadd.f32 %v555_v3, %v482_v55  ;;  %v557_v5 = vpop.f32.mrb[1].mxu0 }
 0x166   : > { %v558_v6 = vadd.f32 %v557_v5, %v482_v55 }
 0x167   : > { %v641_v7 = vmax.f32 %v556_v4, 0.0 }
 0x168   : > { %v642_v8 = vmax.f32 %v558_v6, 0.0  ;;  %v561_v9 = vpop.f32.mrb[2].mxu0  ;;  %659 = sbr.rel (!%p995_p5) target bundleno = 375 (0x177), region = 59 }
 0x169   : > { %647 = vst [vmem:[%s374_s24] sm:$0xff] %v641_v7  ;;  %v562_v10 = vadd.f32 %v561_v9, %v487_v62  ;;  %v563_v11 = vpop.f32.mrb[3].mxu0 }
 0x16a   : > { %648 = vst [vmem:[%s374_s24 + $0x8] sm:$0xff] %v642_v8  ;;  %v564_v12 = vadd.f32 %v563_v11, %v487_v62 }
 0x16b   : > { %v644_v13 = vmax.f32 %v562_v10, 0.0 }
 0x16c   : > { %v645_v14 = vmax.f32 %v564_v12, 0.0 }
 0x16d   : > { %650 = vst [vmem:[%s374_s24 + $0x18] sm:$0xff] %v644_v13 }
 0x16e   : > { %651 = vst [vmem:[%s374_s24 + $0x20] sm:$0xff] %v645_v14 }
 0x170   : > { %v675_v15 = vld [vmem:[%s374_s24] sm:$0xff] }
 0x171   : > { %v677_v16 = vld [vmem:[%s374_s24 + $0x8] sm:$0xff]  ;;  %676 = vst [vmem:[%s662_s27] sm:$0xff] %v675_v15 }
 0x172   : > { %678 = vst [vmem:[%s662_s27 + $0x8] sm:$0xff] %v677_v16 }
 0x174   : > { %v681_v18 = vld [vmem:[%s374_s24 + $0x18] sm:$0xff] }
 0x175   : > { %v683_v19 = vld [vmem:[%s374_s24 + $0x20] sm:$0xff]  ;;  %682 = vst [vmem:[%s662_s27 + $0x48] sm:$0xff] %v681_v18 }
 0x176   : > { %684 = vst [vmem:[%s662_s27 + $0x50] sm:$0xff] %v683_v19 }
 0x177 PF: > { %p10_p10 = scmp.ge.s32.totalorder %s982_s16, 5   ;;  %s1346_s12 = smov %s938_s13 }
 0x178   : > { %s1347_s13 = smov %s993_s19  ;;  %s1348_s14 = smov %s982_s16 }
 0x179   :  { %12 = sbr.rel (!%p10_p10) target bundleno = 2 (0x2), region = 113 }

// kernel: actor_forward.5
= control target key start
LH: loop header
LB: loop body
LE: loop exit
PB: predicated region body
PF: predicated region fallthrough
CT: control target
= control target key end

     0   :  { %s766_s12 = smov 0   ;;  %s768_s13 = smov 0   ;;  %s968_s0 = inlined_call_operand.vmem [shape: f32[32,256], index: 0, kind: input, shape index: {}]   ;;  %s969_s1 = inlined_call_operand.vmem [shape: f32[32,1], index: 1, kind: input, shape index: {}]   ;;  %s970_s2 = inlined_call_operand.vmem [shape: f32[256,256], index: 2, kind: input, shape index: {}]   ;;  %s971_s3 = inlined_call_operand.vmem [shape: f32[32,256], index: 3, kind: output, shape index: {}]  }
   0x1   :  { %s770_s14 = smov 0  }
   0x2 LB: > { %s589_s15 = sadd.s32 4294967295, %s743_s14   ;;  %s783_s16 = sadd.s32 1, %s743_s14   ;;  %s743_s14 = sphi %s770_s14, %s975_s14   ;;  %s739_s13 = sphi %s768_s13, %s974_s13   ;;  %s735_s12 = sphi %s766_s12, %s973_s12  }
   0x3   : > { %s59_s17 = ssub.s32 %s743_s14, %s783_s16  ;;  %s62_s18 = sadd.s32 1, %s739_s13 }
   0x4   : > { %p60_p0 = scmp.eq.s32.totalorder %s59_s17, 0  ;;  %p69_p1 = scmp.ne.s32.totalorder %s739_s13, %s735_s12 }
   0x5   : > { %p70_p2 = scmp.eq.s32.totalorder %s743_s14, 0  ;;  %p99_p3 = scmp.eq.s32.totalorder %s589_s15, 1 }
   0x6   : > { %s794_s19 = scalar_select %p60_p0, %s739_s13, %s62_s18  }
   0x7   : > { %p71_p4 = por %p70_p2, %p69_p1  ;;  %p796_p5 = por %p99_p3, %p69_p1 }
   0x8   : > { %p592_p6 = scmp.ge.s32.totalorder %s743_s14, 2 }
   0xa   : > { %127 = sbr.rel (%p592_p6) target bundleno = 37 (0x25), region = 24 }
  0x11   : > { %130 = sbr.rel (!%p71_p4) target bundleno = 37 (0x25), region = 28  ;;  %s132_s21 = sand.u32 (%p71_p4), 1, %s739_s13  }
  0x12   : > { %s594_s22 = sshll.u32 (%p71_p4), %s743_s14, 3  ;;  %s593_s23 = sshll.u32 (%p71_p4), %s132_s21, 8 }
  0x13   : > { %s806_s26 = scalar_lea.vmem (%p71_p4), %s970_s2, %s594_s22  ;;  %s811_s27 = scalar_lea.vmem (%p71_p4), [#allocation2], %s593_s23 }
  0x14   : > { %v226_v0 = vld [vmem:[%s806_s26] sm:$0xff] (%p71_p4)  ;;  %v228_v1 = vld [vmem:[%s806_s26 + $0x10] sm:$0xff] (%p71_p4) }
  0x15   : > { %v230_v2 = vld [vmem:[%s806_s26 + $0x20] sm:$0xff] (%p71_p4)  ;;  %227 = vst [vmem:[%s811_s27] sm:$0xff] (%p71_p4), %v226_v0  ;;  %229 = vst [vmem:[%s811_s27 + $0x8] sm:$0xff] (%p71_p4), %v228_v1  ;;  %v232_v3 = vld [vmem:[%s806_s26 + $0x30] sm:$0xff] (%p71_p4) }
  0x16   : > { %231 = vst [vmem:[%s811_s27 + $0x10] sm:$0xff] (%p71_p4), %v230_v2  ;;  %v234_v4 = vld [vmem:[%s806_s26 + $0x40] sm:$0xff] (%p71_p4)  ;;  %v236_v5 = vld [vmem:[%s806_s26 + $0x50] sm:$0xff] (%p71_p4)  ;;  %233 = vst [vmem:[%s811_s27 + $0x18] sm:$0xff] (%p71_p4), %v232_v3 }
  0x17   : > { %235 = vst [vmem:[%s811_s27 + $0x20] sm:$0xff] (%p71_p4), %v234_v4  ;;  %237 = vst [vmem:[%s811_s27 + $0x28] sm:$0xff] (%p71_p4), %v236_v5  ;;  %v238_v6 = vld [vmem:[%s806_s26 + $0x60] sm:$0xff] (%p71_p4)  ;;  %v240_v7 = vld [vmem:[%s806_s26 + $0x70] sm:$0xff] (%p71_p4) }
  0x18   : > { %v242_v8 = vld [vmem:[%s806_s26 + $0x80] sm:$0xff]  ;;  %239 = vst [vmem:[%s811_s27 + $0x30] sm:$0xff] %v238_v6  ;;  %241 = vst [vmem:[%s811_s27 + $0x38] sm:$0xff] %v240_v7  ;;  %v244_v9 = vld [vmem:[%s806_s26 + $0x90] sm:$0xff] }
  0x19   : > { %243 = vst [vmem:[%s811_s27 + $0x40] sm:$0xff] %v242_v8  ;;  %v246_v10 = vld [vmem:[%s806_s26 + $0xa0] sm:$0xff]  ;;  %v248_v11 = vld [vmem:[%s806_s26 + $0xb0] sm:$0xff]  ;;  %245 = vst [vmem:[%s811_s27 + $0x48] sm:$0xff] %v244_v9 }
  0x1a   : > { %247 = vst [vmem:[%s811_s27 + $0x50] sm:$0xff] %v246_v10  ;;  %249 = vst [vmem:[%s811_s27 + $0x58] sm:$0xff] %v248_v11  ;;  %v250_v12 = vld [vmem:[%s806_s26 + $0xc0] sm:$0xff]  ;;  %v252_v13 = vld [vmem:[%s806_s26 + $0xd0] sm:$0xff] }
  0x1b   : > { %v254_v14 = vld [vmem:[%s806_s26 + $0xe0] sm:$0xff]  ;;  %251 = vst [vmem:[%s811_s27 + $0x60] sm:$0xff] %v250_v12  ;;  %253 = vst [vmem:[%s811_s27 + $0x68] sm:$0xff] %v252_v13  ;;  %v256_v15 = vld [vmem:[%s806_s26 + $0xf0] sm:$0xff] }
  0x1c   : > { %255 = vst [vmem:[%s811_s27 + $0x70] sm:$0xff] %v254_v14  ;;  %v258_v16 = vld [vmem:[%s806_s26 + $0x100] sm:$0xff]  ;;  %v260_v17 = vld [vmem:[%s806_s26 + $0x110] sm:$0xff]  ;;  %257 = vst [vmem:[%s811_s27 + $0x78] sm:$0xff] %v256_v15 }
  0x1d   : > { %259 = vst [vmem:[%s811_s27 + $0x80] sm:$0xff] %v258_v16  ;;  %261 = vst [vmem:[%s811_s27 + $0x88] sm:$0xff] %v260_v17  ;;  %v262_v18 = vld [vmem:[%s806_s26 + $0x120] sm:$0xff]  ;;  %v264_v19 = vld [vmem:[%s806_s26 + $0x130] sm:$0xff] }
  0x1e   : > { %v266_v20 = vld [vmem:[%s806_s26 + $0x140] sm:$0xff]  ;;  %263 = vst [vmem:[%s811_s27 + $0x90] sm:$0xff] %v262_v18  ;;  %265 = vst [vmem:[%s811_s27 + $0x98] sm:$0xff] %v264_v19  ;;  %v268_v21 = vld [vmem:[%s806_s26 + $0x150] sm:$0xff] }
  0x1f   : > { %267 = vst [vmem:[%s811_s27 + $0xa0] sm:$0xff] %v266_v20  ;;  %v270_v22 = vld [vmem:[%s806_s26 + $0x160] sm:$0xff]  ;;  %v272_v23 = vld [vmem:[%s806_s26 + $0x170] sm:$0xff]  ;;  %269 = vst [vmem:[%s811_s27 + $0xa8] sm:$0xff] %v268_v21 }
  0x20   : > { %271 = vst [vmem:[%s811_s27 + $0xb0] sm:$0xff] %v270_v22  ;;  %273 = vst [vmem:[%s811_s27 + $0xb8] sm:$0xff] %v272_v23  ;;  %v274_v24 = vld [vmem:[%s806_s26 + $0x180] sm:$0xff]  ;;  %v276_v25 = vld [vmem:[%s806_s26 + $0x190] sm:$0xff] }
  0x21   : > { %v278_v26 = vld [vmem:[%s806_s26 + $0x1a0] sm:$0xff]  ;;  %275 = vst [vmem:[%s811_s27 + $0xc0] sm:$0xff] %v274_v24  ;;  %277 = vst [vmem:[%s811_s27 + $0xc8] sm:$0xff] %v276_v25  ;;  %v280_v27 = vld [vmem:[%s806_s26 + $0x1b0] sm:$0xff] }
  0x22   : > { %279 = vst [vmem:[%s811_s27 + $0xd0] sm:$0xff] %v278_v26  ;;  %v282_v28 = vld [vmem:[%s806_s26 + $0x1c0] sm:$0xff]  ;;  %v284_v29 = vld [vmem:[%s806_s26 + $0x1d0] sm:$0xff]  ;;  %281 = vst [vmem:[%s811_s27 + $0xd8] sm:$0xff] %v280_v27 }
  0x23   : > { %283 = vst [vmem:[%s811_s27 + $0xe0] sm:$0xff] %v282_v28  ;;  %285 = vst [vmem:[%s811_s27 + $0xe8] sm:$0xff] %v284_v29  ;;  %v286_v30 = vld [vmem:[%s806_s26 + $0x1e0] sm:$0xff]  ;;  %v288_v31 = vld [vmem:[%s806_s26 + $0x1f0] sm:$0xff] }
  0x24   : > { %287 = vst [vmem:[%s811_s27 + $0xf0] sm:$0xff] %v286_v30  ;;  %289 = vst [vmem:[%s811_s27 + $0xf8] sm:$0xff] %v288_v31 }
  0x25 PF: > { %p595_p7 = scmp.ge.s32.totalorder %s743_s14, 1  ;;  %p294_p8 = scmp.lt.s32.totalorder %s743_s14, 3 }
  0x27   : > { %p295_p9 = pnand %p595_p7, %p294_p8 }
  0x28   : > { %s301_s28 = sand.u32 (!%p295_p9), 1, %s735_s12   ;;  %v356_v32 = vld [vmem:[%s968_s0 + $0x8] sm:$0xff] (!%p295_p9)  ;;  %v745_v34 = vmov (!%p295_p9), 0   ;;  %v365_v35 = vld [vmem:[%s969_s1 + $0x10] sm:$0xff] (!%p295_p9)  ;;  %v363_v61 = vld [vmem:[%s969_s1] sm:$0xff] (!%p295_p9) }
  0x29   : > { %298 = sbr.rel (%p295_p9) target bundleno = 310 (0x136), region = 66  ;;  %v360_v33 = vld [vmem:[%s968_s0 + $0x28] sm:$0xff] (!%p295_p9)  ;;  %s596_s6 = sshll.u32 (!%p295_p9), %s301_s28, 8  ;;  %451 = vmatprep.mubr.f32.mxu0 (!%p295_p9), %v356_v32  ;;  %720 = vset.pattern.permute.xlu1 (!%p295_p9), %v745_v34  ;;  %v366_v62 = vld [vmem:[%s969_s1 + $0x18] sm:$0xff] (!%p295_p9)  ;;  %v355_v23 = vld [vmem:[%s968_s0] sm:$0xff] (!%p295_p9) }
  0x2a   : > { %461 = vmatprep.mubr.f32.mxu1 (!%p295_p9), %v360_v33  ;;  %719 = vset.pattern.permute.xlu0 (!%p295_p9), %v745_v34  ;;  %s888_s9 = scalar_lea.vmem (!%p295_p9), [#allocation2], %s596_s6  ;;  %v364_v0 = vld [vmem:[%s969_s1 + $0x8] sm:$0xff] (!%p295_p9)  ;;  %v359_v24 = vld [vmem:[%s968_s0 + $0x20] sm:$0xff] (!%p295_p9)  ;;  %v358_v25 = vld [vmem:[%s968_s0 + $0x18] sm:$0xff] (!%p295_p9) }
  0x2b   : > { %v339_v36 = vld [vmem:[%s888_s9 + $0x80] sm:$0xff] (!%p295_p9)  ;;  %v340_v37 = vld [vmem:[%s888_s9 + $0x88] sm:$0xff] (!%p295_p9)  ;;  %379 = vperm.xlu1 (!%p295_p9), %720, %v365_v35   ;;  %v341_v41 = vld [vmem:[%s888_s9 + $0x90] sm:$0xff] (!%p295_p9)  ;;  %369 = vperm.xlu0 (!%p295_p9), %719, %v363_v61  }
  0x2c   : > { %v323_v38 = vld [vmem:[%s888_s9] sm:$0xff] (!%p295_p9)  ;;  %v646_v39 = vpack.c.bf16 (!%p295_p9), %v340_v37, %v339_v36  ;;  %v324_v40 = vld [vmem:[%s888_s9 + $0x8] sm:$0xff] (!%p295_p9)  ;;  %v342_v42 = vld [vmem:[%s888_s9 + $0x98] sm:$0xff] (!%p295_p9) }
  0x2d   : > { %v648_v43 = vpack.c.bf16 (!%p295_p9), %v324_v40, %v323_v38  ;;  %v650_v44 = vpack.c.bf16 (!%p295_p9), %v342_v42, %v341_v41  ;;  %v325_v45 = vld [vmem:[%s888_s9 + $0x10] sm:$0xff] (!%p295_p9)  ;;  %v326_v46 = vld [vmem:[%s888_s9 + $0x18] sm:$0xff] (!%p295_p9)  ;;  %v343_v47 = vld [vmem:[%s888_s9 + $0xa0] sm:$0xff] (!%p295_p9) }
  0x2e   : > { %647 = vmatprep.subr.bf16.mxu0 (!%p295_p9), %v646_v39  ;;  %678 = vmatprep.subr.bf16.mxu1 (!%p295_p9), %v646_v39  ;;  %v344_v48 = vld [vmem:[%s888_s9 + $0xa8] sm:$0xff] (!%p295_p9)  ;;  %v652_v49 = vpack.c.bf16 (!%p295_p9), %v326_v46, %v325_v45  ;;  %v327_v51 = vld [vmem:[%s888_s9 + $0x20] sm:$0xff] (!%p295_p9)  ;;  %v345_v53 = vld [vmem:[%s888_s9 + $0xb0] sm:$0xff] (!%p295_p9) }
  0x2f   : > { %649 = vmatpush3.bf16.msra.mxu0 (!%p295_p9), %v648_v43  ;;  %686 = vmatpush3.bf16.msra.mxu1 (!%p295_p9), %v648_v43  ;;  %v654_v50 = vpack.c.bf16 (!%p295_p9), %v344_v48, %v343_v47  ;;  %v328_v52 = vld [vmem:[%s888_s9 + $0x28] sm:$0xff] (!%p295_p9)  ;;  %v346_v54 = vld [vmem:[%s888_s9 + $0xb8] sm:$0xff] (!%p295_p9)  ;;  %v329_v57 = vld [vmem:[%s888_s9 + $0x30] sm:$0xff] (!%p295_p9) }
  0x30   : > { %651 = vmatprep.subr.bf16.mxu0 %v650_v44  ;;  %679 = vmatprep.subr.bf16.mxu1 %v650_v44  ;;  %v656_v55 = vpack.c.bf16 %v328_v52, %v327_v51  ;;  %v658_v56 = vpack.c.bf16 %v346_v54, %v345_v53  ;;  %v330_v58 = vld [vmem:[%s888_s9 + $0x38] sm:$0xff]  ;;  %v347_v59 = vld [vmem:[%s888_s9 + $0xc0] sm:$0xff]  ;;  %v348_v60 = vld [vmem:[%s888_s9 + $0xc8] sm:$0xff]  ;;  %s599_s12 = sshll.u32 (%p796_p5), %s589_s15, 3 }
  0x31   : > { %v660_v63 = vpack.c.bf16 %v330_v58, %v329_v57  ;;  %v662_v1 = vpack.c.bf16 %v348_v60, %v347_v59  ;;  %v331_v2 = vld [vmem:[%s888_s9 + $0x40] sm:$0xff]  ;;  %v332_v3 = vld [vmem:[%s888_s9 + $0x48] sm:$0xff]  ;;  %v349_v4 = vld [vmem:[%s888_s9 + $0xd0] sm:$0xff]  ;;  %384 = vperm.xlu1 %720, %v366_v62   ;;  %374 = vperm.xlu0 %719, %v364_v0   ;;  %s488_s17 = scalar_lea.vmem (%p796_p5), %s971_s3, %s599_s12 }
  0x32   : > { %v350_v5 = vld [vmem:[%s888_s9 + $0xd8] sm:$0xff]  ;;  %v664_v6 = vpack.c.bf16 %v332_v3, %v331_v2  ;;  %v333_v8 = vld [vmem:[%s888_s9 + $0x50] sm:$0xff]  ;;  %v351_v10 = vld [vmem:[%s888_s9 + $0xe0] sm:$0xff] }
  0x33   : > { %653 = vmatpush3.bf16.msra.mxu0 %v652_v49  ;;  %687 = vmatpush3.bf16.msra.mxu1 %v652_v49  ;;  %v666_v7 = vpack.c.bf16 %v350_v5, %v349_v4  ;;  %v334_v9 = vld [vmem:[%s888_s9 + $0x58] sm:$0xff]  ;;  %v352_v11 = vld [vmem:[%s888_s9 + $0xe8] sm:$0xff]  ;;  %v335_v14 = vld [vmem:[%s888_s9 + $0x60] sm:$0xff] }
  0x34   : > { %655 = vmatprep.subr.bf16.mxu0 %v654_v50  ;;  %680 = vmatprep.subr.bf16.mxu1 %v654_v50  ;;  %v668_v12 = vpack.c.bf16 %v334_v9, %v333_v8  ;;  %v670_v13 = vpack.c.bf16 %v352_v11, %v351_v10  ;;  %v336_v15 = vld [vmem:[%s888_s9 + $0x68] sm:$0xff]  ;;  %v353_v16 = vld [vmem:[%s888_s9 + $0xf0] sm:$0xff]  ;;  %v354_v17 = vld [vmem:[%s888_s9 + $0xf8] sm:$0xff] }
  0x35   : > { %v672_v18 = vpack.c.bf16 %v336_v15, %v335_v14  ;;  %v674_v19 = vpack.c.bf16 %v354_v17, %v353_v16  ;;  %v337_v20 = vld [vmem:[%s888_s9 + $0x70] sm:$0xff]  ;;  %v338_v21 = vld [vmem:[%s888_s9 + $0x78] sm:$0xff]  ;;  %s597_s9 = sshll.u32 %s301_s28, 5 }
  0x36   : > { %v676_v22 = vpack.c.bf16 %v338_v21, %v337_v20  ;;  %v362_v26 = vld [vmem:[%s968_s0 + $0x38] sm:$0xff]  ;;  %v357_v27 = vld [vmem:[%s968_s0 + $0x10] sm:$0xff]  ;;  %s322_s10 = scalar_lea.vmem [#allocation3], %s597_s9 }
  0x37   : > { %657 = vmatpush3.bf16.msra.mxu0 %v656_v55  ;;  %688 = vmatpush3.bf16.msra.mxu1 %v656_v55  ;;  %v361_v28 = vld [vmem:[%s968_s0 + $0x30] sm:$0xff] }
  0x38   : > { %659 = vmatprep.subr.bf16.mxu0 %v658_v56  ;;  %681 = vmatprep.subr.bf16.mxu1 %v658_v56 }
  0x3b   : > { %661 = vmatpush3.bf16.msra.mxu0 %v660_v63  ;;  %689 = vmatpush3.bf16.msra.mxu1 %v660_v63 }
  0x3c   : > { %663 = vmatprep.subr.bf16.mxu0 %v662_v1  ;;  %682 = vmatprep.subr.bf16.mxu1 %v662_v1 }
  0x3f   : > { %665 = vmatpush3.bf16.msra.mxu0 %v664_v6  ;;  %690 = vmatpush3.bf16.msra.mxu1 %v664_v6 }
  0x40   : > { %667 = vmatprep.subr.bf16.mxu0 %v666_v7  ;;  %683 = vmatprep.subr.bf16.mxu1 %v666_v7 }
  0x43   : > { %669 = vmatpush3.bf16.msra.mxu0 %v668_v12  ;;  %691 = vmatpush3.bf16.msra.mxu1 %v668_v12 }
  0x44   : > { %671 = vmatprep.subr.bf16.mxu0 %v670_v13  ;;  %684 = vmatprep.subr.bf16.mxu1 %v670_v13 }
  0x47   : > { %673 = vmatpush3.bf16.msra.mxu0 %v672_v18  ;;  %692 = vmatpush3.bf16.msra.mxu1 %v672_v18 }
  0x48   : > { %675 = vmatprep.subr.bf16.mxu0 %v674_v19  ;;  %685 = vmatprep.subr.bf16.mxu1 %v674_v19 }
  0x4b   : > { %677 = vmatpush3.bf16.msra.mxu0 %v676_v22  ;;  %693 = vmatpush3.bf16.msra.mxu1 %v676_v22 }
  0x4e   : > { %452 = vmatmul.mubr.f32.vlgmr.msra.gmra.mrb[0].mxu0 %v355_v23  ;;  %462 = vmatmul.mubr.f32.vlgmr.msra.gmra.mrb[0].mxu1 %v359_v24 }
  0x4f   : > { %456 = vmatprep.mubr.f32.mxu0 %v358_v25  ;;  %466 = vmatprep.mubr.f32.mxu1 %v362_v26 }
  0x52   : > { %457 = vmatmul.mubr.f32.gmra.mrb[2].mxu0 %v357_v27  ;;  %467 = vmatmul.mubr.f32.gmra.mrb[2].mxu1 %v361_v28 }
  0xaa   : > { %v380_v29 = vpop.permute.xlu1 %379  ;;  %v370_v30 = vpop.permute.xlu0 %369 }
  0xb0   : > { %v385_v47 = vpop.permute.xlu1 %384  ;;  %v375_v48 = vpop.permute.xlu0 %374 }
 0x121   : > { %v634_v31 = vpop.f32.mrb[0].mxu0  ;;  %v640_v32 = vpop.f32.mrb[0].mxu1 }
 0x122   : > { %v635_v33 = vpop.f32.mrb[1].mxu0  ;;  %v641_v34 = vpop.f32.mrb[1].mxu1 }
 0x123   : > { %v636_v35 = vadd.f32 %v635_v33, %v634_v31  ;;  %v642_v36 = vadd.f32 %v641_v34, %v640_v32 }
 0x125   : > { %v454_v37 = vadd.f32 %v636_v35, %v370_v30  ;;  %v464_v38 = vadd.f32 %v642_v36, %v380_v29  ;;  %v637_v39 = vpop.f32.mrb[2].mxu0  ;;  %v643_v40 = vpop.f32.mrb[2].mxu1 }
 0x126   : > { %v638_v41 = vpop.f32.mrb[3].mxu0  ;;  %v644_v42 = vpop.f32.mrb[3].mxu1 }
 0x127   : > { %v472_v43 = vmax.f32 %v454_v37, 0.0  ;;  %v474_v44 = vmax.f32 %v464_v38, 0.0  ;;  %v639_v45 = vadd.f32 %v638_v41, %v637_v39  ;;  %v645_v46 = vadd.f32 %v644_v42, %v643_v40  ;;  %486 = sbr.rel (!%p796_p5) target bundleno = 310 (0x136), region = 74 }
 0x129   : > { %476 = vst [vmem:[%s322_s10] sm:$0xff] %v472_v43  ;;  %478 = vst [vmem:[%s322_s10 + $0x10] sm:$0xff] %v474_v44  ;;  %v459_v49 = vadd.f32 %v639_v45, %v375_v48  ;;  %v469_v50 = vadd.f32 %v645_v46, %v385_v47 }
 0x12b   : > { %v473_v51 = vmax.f32 %v459_v49, 0.0  ;;  %v475_v52 = vmax.f32 %v469_v50, 0.0 }
 0x12d   : > { %477 = vst [vmem:[%s322_s10 + $0x8] sm:$0xff] %v473_v51  ;;  %479 = vst [vmem:[%s322_s10 + $0x18] sm:$0xff] %v475_v52 }
 0x130   : > { %v522_v53 = vld [vmem:[%s322_s10] sm:$0xff]  ;;  %v526_v55 = vld [vmem:[%s322_s10 + $0x10] sm:$0xff] }
 0x131   : > { %523 = vst [vmem:[%s488_s17] sm:$0xff] %v522_v53  ;;  %527 = vst [vmem:[%s488_s17 + $0x20] sm:$0xff] %v526_v55 }
 0x134   : > { %v524_v54 = vld [vmem:[%s322_s10 + $0x8] sm:$0xff]  ;;  %v528_v56 = vld [vmem:[%s322_s10 + $0x18] sm:$0xff] }
 0x135   : > { %525 = vst [vmem:[%s488_s17 + $0x10] sm:$0xff] %v524_v54  ;;  %529 = vst [vmem:[%s488_s17 + $0x30] sm:$0xff] %v528_v56 }
 0x136 PF: > { %p10_p10 = scmp.ge.s32.totalorder %s783_s16, 4   ;;  %s973_s12 = smov %s739_s13 }
 0x137   : > { %s974_s13 = smov %s794_s19  ;;  %s975_s14 = smov %s783_s16 }
 0x138   :  { %12 = sbr.rel (!%p10_p10) target bundleno = 2 (0x2), region = 143 }

// kernel: actor_forward.6
= control target key start
LH: loop header
LB: loop body
LE: loop exit
PB: predicated region body
PF: predicated region fallthrough
CT: control target
= control target key end

     0   :  { %v702_v3 = vmov 0   ;;  %vm128_vm0 = vcmask 261120   ;;  %vm399_vm1 = vcmask 523264   ;;  %s988_s4 = inlined_call_operand.vmem [shape: f32[288,128], index: 4, kind: input, shape index: {}]   ;;  %s989_s0 = inlined_call_operand.vmem [shape: f32[64,288], index: 0, kind: input, shape index: {}]   ;;  %s990_s1 = inlined_call_operand.vmem [shape: f32[64,1], index: 1, kind: input, shape index: {}]   ;;  %s991_s3 = inlined_call_operand.vmem [shape: f32[32,1], index: 3, kind: input, shape index: {}]   ;;  %s992_s2 = inlined_call_operand.vmem [shape: f32[32,64], index: 2, kind: input, shape index: {}]   ;;  %s993_s5 = inlined_call_operand.vmem [shape: f32[32,128], index: 5, kind: output, shape index: {}]  }
   0x1   :  { %v36_v0 = vld [vmem:[%s988_s4 + $0x80] sm:$0xff]  ;;  %v37_v1 = vld [vmem:[%s988_s4 + $0x88] sm:$0xff]  ;;  %700 = vset.pattern.permute.xlu0 %v702_v3  ;;  %701 = vset.pattern.permute.xlu1 %v702_v3  ;;  %v38_v6 = vld [vmem:[%s988_s4 + $0x90] sm:$0xff] }
   0x2   :  { %v20_v2 = vld [vmem:[%s988_s4] sm:$0xff]  ;;  %v643_v4 = vpack.c.bf16 %v37_v1, %v36_v0  ;;  %v21_v5 = vld [vmem:[%s988_s4 + $0x8] sm:$0xff]  ;;  %v39_v7 = vld [vmem:[%s988_s4 + $0x98] sm:$0xff] }
   0x3   :  { %v645_v8 = vpack.c.bf16 %v21_v5, %v20_v2  ;;  %v647_v9 = vpack.c.bf16 %v39_v7, %v38_v6  ;;  %v22_v10 = vld [vmem:[%s988_s4 + $0x10] sm:$0xff]  ;;  %v23_v11 = vld [vmem:[%s988_s4 + $0x18] sm:$0xff]  ;;  %v40_v12 = vld [vmem:[%s988_s4 + $0xa0] sm:$0xff] }
   0x4   :  { %644 = vmatprep.subr.bf16.mxu0 %v643_v4  ;;  %v41_v13 = vld [vmem:[%s988_s4 + $0xa8] sm:$0xff]  ;;  %v649_v14 = vpack.c.bf16 %v23_v11, %v22_v10  ;;  %v24_v16 = vld [vmem:[%s988_s4 + $0x20] sm:$0xff]  ;;  %v42_v18 = vld [vmem:[%s988_s4 + $0xb0] sm:$0xff] }
   0x5   :  { %646 = vmatpush3.bf16.msra.mxu0 %v645_v8  ;;  %v651_v15 = vpack.c.bf16 %v41_v13, %v40_v12  ;;  %v25_v17 = vld [vmem:[%s988_s4 + $0x28] sm:$0xff]  ;;  %v43_v19 = vld [vmem:[%s988_s4 + $0xb8] sm:$0xff]  ;;  %v26_v22 = vld [vmem:[%s988_s4 + $0x30] sm:$0xff] }
   0x6   :  { %648 = vmatprep.subr.bf16.mxu0 %v647_v9  ;;  %v653_v20 = vpack.c.bf16 %v25_v17, %v24_v16  ;;  %v655_v21 = vpack.c.bf16 %v43_v19, %v42_v18  ;;  %v27_v23 = vld [vmem:[%s988_s4 + $0x38] sm:$0xff]  ;;  %v44_v24 = vld [vmem:[%s988_s4 + $0xc0] sm:$0xff]  ;;  %v45_v25 = vld [vmem:[%s988_s4 + $0xc8] sm:$0xff] }
   0x7   :  { %v52_v26 = vld [vmem:[%s988_s4 + $0x100] sm:$0xff]  ;;  %v53_v27 = vld [vmem:[%s988_s4 + $0x108] sm:$0xff]  ;;  %v657_v30 = vpack.c.bf16 %v27_v23, %v26_v22  ;;  %v54_v31 = vld [vmem:[%s988_s4 + $0x110] sm:$0xff]  ;;  %v659_v33 = vpack.c.bf16 %v45_v25, %v44_v24 }
   0x8   :  { %v675_v28 = vpack.c.bf16 %v53_v27, %v52_v26  ;;  %v57_v29 = vld [vmem:[%s989_s0 + $0x8] sm:$0xff]  ;;  %v55_v32 = vld [vmem:[%s988_s4 + $0x118] sm:$0xff]  ;;  %v28_v34 = vld [vmem:[%s988_s4 + $0x40] sm:$0xff] }
   0x9   :  { %650 = vmatpush3.bf16.msra.mxu0 %v649_v14  ;;  %217 = vmatprep.mubr.f32.mxu0 %v57_v29  ;;  %v29_v35 = vld [vmem:[%s988_s4 + $0x48] sm:$0xff]  ;;  %v679_v36 = vpack.c.bf16 %v55_v32, %v54_v31  ;;  %v58_v37 = vld [vmem:[%s989_s0 + $0x10] sm:$0xff]  ;;  %v47_v39 = vld [vmem:[%s988_s4 + $0xd8] sm:$0xff] }
   0xa   :  { %652 = vmatprep.subr.bf16.mxu0 %v651_v15  ;;  %676 = vmatprep.subr.bf16.mxu1 %v675_v28  ;;  %v46_v38 = vld [vmem:[%s988_s4 + $0xd0] sm:$0xff]  ;;  %v661_v40 = vpack.c.bf16 %v29_v35, %v28_v34  ;;  %v31_v43 = vld [vmem:[%s988_s4 + $0x58] sm:$0xff]  ;;  %v48_v44 = vld [vmem:[%s988_s4 + $0xe0] sm:$0xff] }
   0xb   :  { %678 = vmatpush3.bf16.msra.mxu1 %v675_v28  ;;  %609 = vmatprep.mubr.msk.f32.mxu1 %vm128_vm0, %v58_v37  ;;  %v663_v41 = vpack.c.bf16 %v47_v39, %v46_v38  ;;  %v30_v42 = vld [vmem:[%s988_s4 + $0x50] sm:$0xff]  ;;  %v49_v45 = vld [vmem:[%s988_s4 + $0xe8] sm:$0xff]  ;;  %v64_v47 = vld [vmem:[%s989_s0 + $0x40] sm:$0xff] }
   0xc   :  { %680 = vmatprep.subr.bf16.mxu1 %v679_v36  ;;  %v61_v46 = vld [vmem:[%s989_s0 + $0x28] sm:$0xff]  ;;  %v665_v48 = vpack.c.bf16 %v31_v43, %v30_v42  ;;  %v80_v49 = vld [vmem:[%s990_s1] sm:$0xff]  ;;  %v82_v50 = vld [vmem:[%s990_s1 + $0x10] sm:$0xff]  ;;  %v667_v51 = vpack.c.bf16 %v49_v45, %v48_v44 }
   0xd   :  { %654 = vmatpush3.bf16.msra.mxu0 %v653_v20  ;;  %v32_v52 = vld [vmem:[%s988_s4 + $0x60] sm:$0xff]  ;;  %v33_v53 = vld [vmem:[%s988_s4 + $0x68] sm:$0xff]  ;;  %v50_v54 = vld [vmem:[%s988_s4 + $0xf0] sm:$0xff]  ;;  %90 = vperm.xlu0 %700, %v80_v49  }
   0xe   :  { %656 = vmatprep.subr.bf16.mxu0 %v655_v21  ;;  %v51_v55 = vld [vmem:[%s988_s4 + $0xf8] sm:$0xff]  ;;  %v70_v57 = vld [vmem:[%s989_s0 + $0x70] sm:$0xff]  ;;  %100 = vperm.xlu1 %701, %v82_v50   ;;  %v81_v58 = vld [vmem:[%s990_s1 + $0x8] sm:$0xff]  ;;  %v669_v59 = vpack.c.bf16 %v33_v53, %v32_v52 }
   0xf   :  { %682 = vmatpush3.bf16.msra.mxu1 %v679_v36  ;;  %v67_v56 = vld [vmem:[%s989_s0 + $0x58] sm:$0xff]  ;;  %v671_v61 = vpack.c.bf16 %v51_v55, %v50_v54  ;;  %v34_v62 = vld [vmem:[%s988_s4 + $0x70] sm:$0xff]  ;;  %v73_v0 = vld [vmem:[%s989_s0 + $0x88] sm:$0xff] }
  0x10   :  { %v83_v60 = vld [vmem:[%s990_s1 + $0x18] sm:$0xff]  ;;  %v76_v1 = vld [vmem:[%s989_s0 + $0xa0] sm:$0xff]  ;;  %v85_v4 = vld [vmem:[%s990_s1 + $0x28] sm:$0xff] }
  0x11   :  { %658 = vmatpush3.bf16.msra.mxu0 %v657_v30  ;;  %v35_v63 = vld [vmem:[%s988_s4 + $0x78] sm:$0xff]  ;;  %95 = vperm.xlu0 %700, %v81_v58   ;;  %v84_v2 = vld [vmem:[%s990_s1 + $0x20] sm:$0xff]  ;;  %v86_v6 = vld [vmem:[%s990_s1 + $0x30] sm:$0xff] }
  0x12   :  { %660 = vmatprep.subr.bf16.mxu0 %v659_v33  ;;  %610 = vmatmul.mubr.msk.f32.vlgmr.msra.gmra.mrb[0].mxu1 %vm128_vm0, %v61_v46  ;;  %v673_v3 = vpack.c.bf16 %v35_v63, %v34_v62  ;;  %v79_v5 = vld [vmem:[%s989_s0 + $0xb8] sm:$0xff]  ;;  %v56_v7 = vld [vmem:[%s989_s0] sm:$0xff]  ;;  %v376_v12 = vld [vmem:[%s991_s3 + $0x8] sm:$0xff] }
  0x13   :  { %612 = vmatprep.mubr.msk.f32.mxu1 %vm128_vm0, %v64_v47  ;;  %105 = vperm.xlu1 %701, %v83_v60   ;;  %v87_v8 = vld [vmem:[%s990_s1 + $0x38] sm:$0xff]  ;;  %v60_v9 = vld [vmem:[%s989_s0 + $0x20] sm:$0xff]  ;;  %v377_v14 = vld [vmem:[%s991_s3 + $0x10] sm:$0xff] }
  0x14   :  { %v375_v10 = vld [vmem:[%s991_s3] sm:$0xff]  ;;  %v59_v11 = vld [vmem:[%s989_s0 + $0x18] sm:$0xff]  ;;  %v62_v15 = vld [vmem:[%s989_s0 + $0x30] sm:$0xff] }
  0x15   :  { %662 = vmatpush3.bf16.msra.mxu0 %v661_v40  ;;  %110 = vperm.xlu0 %700, %v84_v2   ;;  %v63_v13 = vld [vmem:[%s989_s0 + $0x38] sm:$0xff]  ;;  %v66_v17 = vld [vmem:[%s989_s0 + $0x50] sm:$0xff]  ;;  %v65_v18 = vld [vmem:[%s989_s0 + $0x48] sm:$0xff] }
  0x16   :  { %664 = vmatprep.subr.bf16.mxu0 %v663_v41  ;;  %613 = vmatmul.mubr.msk.f32.gmra.mrb[2].mxu1 %vm128_vm0, %v67_v56  ;;  %v378_v16 = vld [vmem:[%s991_s3 + $0x18] sm:$0xff]  ;;  %v69_v19 = vld [vmem:[%s989_s0 + $0x68] sm:$0xff]  ;;  %v68_v20 = vld [vmem:[%s989_s0 + $0x60] sm:$0xff] }
  0x17   :  { %615 = vmatprep.mubr.msk.f32.mxu1 %vm128_vm0, %v70_v57  ;;  %115 = vperm.xlu1 %701, %v85_v4   ;;  %v72_v21 = vld [vmem:[%s989_s0 + $0x80] sm:$0xff]  ;;  %v71_v22 = vld [vmem:[%s989_s0 + $0x78] sm:$0xff]  ;;  %v74_v24 = vld [vmem:[%s989_s0 + $0x90] sm:$0xff] }
  0x18   :  { %v75_v23 = vld [vmem:[%s989_s0 + $0x98] sm:$0xff]  ;;  %v78_v25 = vld [vmem:[%s989_s0 + $0xb0] sm:$0xff]  ;;  %v77_v26 = vld [vmem:[%s989_s0 + $0xa8] sm:$0xff] }
  0x19   :  { %666 = vmatpush3.bf16.msra.mxu0 %v665_v48  ;;  %120 = vperm.xlu0 %700, %v86_v6   ;;  %v371_v27 = vld [vmem:[%s992_s2] sm:$0xff] }
  0x1a   :  { %668 = vmatprep.subr.bf16.mxu0 %v667_v51  ;;  %616 = vmatmul.mubr.msk.f32.gmra.mrb[4].mxu1 %vm128_vm0, %v73_v0 }
  0x1b   :  { %618 = vmatprep.mubr.msk.f32.mxu1 %vm128_vm0, %v76_v1  ;;  %125 = vperm.xlu1 %701, %v87_v8  }
  0x1d   :  { %670 = vmatpush3.bf16.msra.mxu0 %v669_v59  ;;  %381 = vperm.xlu0 %700, %v375_v10  }
  0x1e   :  { %672 = vmatprep.subr.bf16.mxu0 %v671_v61  ;;  %619 = vmatmul.mubr.msk.f32.gmra.mrb[6].mxu1 %vm128_vm0, %v79_v5 }
  0x1f   :  { %386 = vperm.xlu1 %701, %v376_v12   ;;  %637 = vmatprep.mubr.msk.f32.mxu1 %vm399_vm1, %v371_v27 }
  0x21   :  { %674 = vmatpush3.bf16.msra.mxu0 %v673_v3  ;;  %391 = vperm.xlu0 %700, %v377_v14  }
  0x23   :  { %396 = vperm.xlu1 %701, %v378_v16  }
  0x24   :  { %218 = vmatmul.mubr.f32.vlgmr.msra.gmra.mrb[0].mxu0 %v56_v7 }
  0x25   :  { %222 = vmatprep.mubr.f32.mxu0 %v60_v9 }
  0x28   :  { %223 = vmatmul.mubr.f32.gmra.mrb[2].mxu0 %v59_v11 }
  0x29   :  { %227 = vmatprep.mubr.f32.mxu0 %v63_v13 }
  0x2c   :  { %228 = vmatmul.mubr.f32.gmra.mrb[4].mxu0 %v62_v15 }
  0x2d   :  { %232 = vmatprep.mubr.f32.mxu0 %v66_v17 }
  0x30   :  { %233 = vmatmul.mubr.f32.gmra.mrb[6].mxu0 %v65_v18 }
  0x31   :  { %237 = vmatprep.mubr.f32.mxu0 %v69_v19 }
  0x34   :  { %238 = vmatmul.mubr.f32.gmra.mrb[8].mxu0 %v68_v20 }
  0x35   :  { %242 = vmatprep.mubr.f32.mxu0 %v72_v21 }
  0x38   :  { %243 = vmatmul.mubr.f32.gmra.mrb[10].mxu0 %v71_v22 }
  0x39   :  { %247 = vmatprep.mubr.f32.mxu0 %v75_v23 }
  0x3c   :  { %248 = vmatmul.mubr.f32.gmra.mrb[12].mxu0 %v74_v24 }
  0x3d   :  { %252 = vmatprep.mubr.f32.mxu0 %v78_v25 }
  0x40   :  { %253 = vmatmul.mubr.f32.gmra.mrb[14].mxu0 %v77_v26 }
  0x8c   :  { %v91_v37 = vpop.permute.xlu0 %90 }
  0x8d   :  { %v101_v48 = vpop.permute.xlu1 %100 }
  0x90   :  { %v96_v45 = vpop.permute.xlu0 %95 }
  0x92   :  { %v106_v60 = vpop.permute.xlu1 %105 }
  0x94   :  { %v111_v2 = vpop.permute.xlu0 %110 }
  0x96   :  { %v116_v11 = vpop.permute.xlu1 %115 }
  0x98   :  { %v121_v17 = vpop.permute.xlu0 %120 }
  0x9a   :  { %v126_v26 = vpop.permute.xlu1 %125 }
  0xe5   :  { %v611_v28 = vpop.f32.mrb[0].mxu1 }
  0xe6   :  { %v324_v29 = vpop.f32.mrb[1].mxu1 }
  0xe9   :  { %v614_v30 = vpop.f32.mrb[2].mxu1 }
  0xea   :  { %v334_v31 = vpop.f32.mrb[3].mxu1 }
  0xed   :  { %v617_v32 = vpop.f32.mrb[4].mxu1 }
  0xee   :  { %v344_v33 = vpop.f32.mrb[5].mxu1 }
  0xf1   :  { %v961_v34 = vpop.f32.mrb[6].mxu1 }
  0xf2   :  { %v354_v35 = vpop.f32.mrb[7].mxu1 }
  0xf7   :  { %v553_v36 = vpop.f32.mrb[0].mxu0 }
  0xf8   :  { %v554_v38 = vpop.f32.mrb[1].mxu0 }
  0xf9   :  { %v555_v39 = vadd.f32 %v554_v38, %v553_v36  ;;  %v382_v36 = vpop.permute.xlu0 %381 }
  0xfb   :  { %v556_v40 = vpop.f32.mrb[2].mxu0  ;;  %v220_v41 = vadd.f32 %v555_v39, %v91_v37 }
  0xfc   :  { %v557_v42 = vpop.f32.mrb[3].mxu0 }
  0xfd   :  { %v558_v43 = vadd.f32 %v557_v42, %v556_v40  ;;  %v325_v44 = vadd.f32 %v324_v29, %v220_v41 }
  0xff   :  { %v225_v46 = vadd.f32 %v558_v43, %v96_v45  ;;  %v559_v47 = vpop.f32.mrb[4].mxu0  ;;  %v363_v52 = vmax.f32 %v325_v44, 0.0  ;;  %v392_v45 = vpop.permute.xlu0 %391 }
 0x100   :  { %v560_v49 = vpop.f32.mrb[5].mxu0 }
 0x101   :  { %v330_v50 = vadd.f32 %v611_v28, %v225_v46  ;;  %v561_v51 = vadd.f32 %v560_v49, %v559_v47 }
 0x103   :  { %v364_v53 = vmax.f32 %v330_v50, 0.0  ;;  %v562_v54 = vpop.f32.mrb[6].mxu0  ;;  %v230_v55 = vadd.f32 %v561_v51, %v101_v48 }
 0x104   :  { %v563_v56 = vpop.f32.mrb[7].mxu0 }
 0x105   :  { %v683_v57 = vpack.c.bf16 %v364_v53, %v363_v52  ;;  %v564_v58 = vadd.f32 %v563_v56, %v562_v54  ;;  %v335_v59 = vadd.f32 %v334_v31, %v230_v55 }
 0x107   :  { %v235_v61 = vadd.f32 %v564_v58, %v106_v60  ;;  %v565_v62 = vpop.f32.mrb[8].mxu0  ;;  %684 = vmatprep.subr.bf16.mxu1 %v683_v57  ;;  %v365_v3 = vmax.f32 %v335_v59, 0.0 }
 0x108   :  { %v566_v63 = vpop.f32.mrb[9].mxu0  ;;  %686 = vmatpush3.bf16.msra.mxu1 %v683_v57 }
 0x109   :  { %v340_v0 = vadd.f32 %v614_v30, %v235_v61  ;;  %v567_v1 = vadd.f32 %v566_v63, %v565_v62 }
 0x10b   :  { %v366_v4 = vmax.f32 %v340_v0, 0.0  ;;  %v568_v5 = vpop.f32.mrb[10].mxu0  ;;  %v240_v6 = vadd.f32 %v567_v1, %v111_v2 }
 0x10c   :  { %v569_v7 = vpop.f32.mrb[11].mxu0 }
 0x10d   :  { %v687_v8 = vpack.c.bf16 %v366_v4, %v365_v3  ;;  %v570_v9 = vadd.f32 %v569_v7, %v568_v5  ;;  %v345_v10 = vadd.f32 %v344_v33, %v240_v6  ;;  %v373_v33 = vld [vmem:[%s992_s2 + $0x10] sm:$0xff] }
 0x10f   :  { %v245_v12 = vadd.f32 %v570_v9, %v116_v11  ;;  %v571_v13 = vpop.f32.mrb[12].mxu0  ;;  %688 = vmatprep.subr.bf16.mxu1 %v687_v8  ;;  %v367_v18 = vmax.f32 %v345_v10, 0.0 }
 0x110   :  { %v572_v14 = vpop.f32.mrb[13].mxu0  ;;  %690 = vmatpush3.bf16.msra.mxu1 %v687_v8 }
 0x111   :  { %v350_v15 = vadd.f32 %v617_v32, %v245_v12  ;;  %v573_v16 = vadd.f32 %v572_v14, %v571_v13  ;;  %v372_v32 = vld [vmem:[%s992_s2 + $0x8] sm:$0xff] }
 0x113   :  { %v368_v19 = vmax.f32 %v350_v15, 0.0  ;;  %v574_v20 = vpop.f32.mrb[14].mxu0  ;;  %v250_v21 = vadd.f32 %v573_v16, %v121_v17 }
 0x114   :  { %v575_v22 = vpop.f32.mrb[15].mxu0 }
 0x115   :  { %v691_v23 = vpack.c.bf16 %v368_v19, %v367_v18  ;;  %v576_v24 = vadd.f32 %v575_v22, %v574_v20  ;;  %v355_v25 = vadd.f32 %v354_v35, %v250_v21  ;;  %v387_v35 = vpop.permute.xlu1 %386 }
 0x117   :  { %v255_v27 = vadd.f32 %v576_v24, %v126_v26  ;;  %692 = vmatprep.subr.bf16.mxu1 %v691_v23  ;;  %v369_v29 = vmax.f32 %v355_v25, 0.0 }
 0x118   :  { %694 = vmatpush3.bf16.msra.mxu1 %v691_v23 }
 0x119   :  { %v360_v28 = vadd.f32 %v961_v34, %v255_v27  ;;  %v374_v34 = vld [vmem:[%s992_s2 + $0x18] sm:$0xff]  ;;  %v397_v42 = vpop.permute.xlu1 %396 }
 0x11b   :  { %v370_v30 = vmax.f32 %v360_v28, 0.0 }
 0x11d   :  { %v695_v31 = vpack.c.bf16 %v370_v30, %v369_v29 }
 0x11f   :  { %696 = vmatprep.subr.bf16.mxu1 %v695_v31 }
 0x120   :  { %698 = vmatpush3.bf16.msra.mxu1 %v695_v31 }
 0x123   :  { %638 = vmatmul.mubr.msk.f32.vlgmr.msra.gmra.mrb[8].mxu1 %vm399_vm1, %v372_v32 }
 0x124   :  { %640 = vmatprep.mubr.msk.f32.mxu1 %vm399_vm1, %v373_v33 }
 0x127   :  { %641 = vmatmul.mubr.msk.f32.gmra.mrb[10].mxu1 %vm399_vm1, %v374_v34 }
 0x1f6   :  { %v639_v37 = vpop.f32.mrb[8].mxu1 }
 0x1f7   :  { %v484_v38 = vadd.f32 %v639_v37, %v387_v35  ;;  %v478_v39 = vpop.f32.mrb[9].mxu1 }
 0x1f8   :  { %v479_v40 = vadd.f32 %v478_v39, %v382_v36 }
 0x1f9   :  { %v498_v41 = vmax.f32 %v484_v38, 0.0 }
 0x1fa   :  { %v497_v43 = vmax.f32 %v479_v40, 0.0  ;;  %v642_v44 = vpop.f32.mrb[10].mxu1 }
 0x1fb   :  { %502 = vst [vmem:[%s993_s5 + $0x8] sm:$0xff] %v498_v41  ;;  %v494_v46 = vadd.f32 %v642_v44, %v397_v42  ;;  %v488_v47 = vpop.f32.mrb[11].mxu1 }
 0x1fc   :  { %501 = vst [vmem:[%s993_s5] sm:$0xff] %v497_v43  ;;  %v489_v48 = vadd.f32 %v488_v47, %v392_v45 }
 0x1fd   :  { %v500_v49 = vmax.f32 %v494_v46, 0.0 }
 0x1fe   :  { %v499_v50 = vmax.f32 %v489_v48, 0.0 }
 0x1ff   :  { %504 = vst [vmem:[%s993_s5 + $0x18] sm:$0xff] %v500_v49 }
 0x200   :  { %503 = vst [vmem:[%s993_s5 + $0x10] sm:$0xff] %v499_v50 }

// kernel: actor_forward.7
= control target key start
LH: loop header
LB: loop body
LE: loop exit
PB: predicated region body
PF: predicated region fallthrough
CT: control target
= control target key end

     0   :  { %vm47_vm0 = vcmask 1046528   ;;  %vm43_vm1 = vcmask 56320   ;;  %v1108_v0 = vmov 0.0   ;;  %vm1109_vm2 = vmmov 0   ;;  %s1607_s2 = inlined_call_operand.vmem [shape: f32[7,64], index: 2, kind: input, shape index: {}]   ;;  %s1608_s1 = inlined_call_operand.vmem [shape: f32[8,7], index: 1, kind: input, shape index: {}]   ;;  %s1609_s4 = inlined_call_operand.vmem [shape: f32[800,128], index: 4, kind: input, shape index: {}]   ;;  %s1610_s5 = inlined_call_operand.vmem [shape: f32[64,128], index: 5, kind: input, shape index: {}]   ;;  %s1611_s0 = inlined_call_operand.vmem [shape: f32[8,800], index: 0, kind: input, shape index: {}]   ;;  %s1612_s3 = inlined_call_operand.vmem [shape: f32[1,64], index: 3, kind: input, shape index: {}]   ;;  %s1613_s7 = inlined_call_operand.vmem [shape: f32[128,4], index: 7, kind: input, shape index: {}]   ;;  %s1614_s6 = inlined_call_operand.vmem [shape: f32[1,128], index: 6, kind: input, shape index: {}]   ;;  %s1615_s8 = inlined_call_operand.vmem [shape: f32[1,4], index: 8, kind: input, shape index: {}]   ;;  %s1616_s9 = inlined_call_operand.vmem [shape: f32[8,2], index: 9, kind: output, shape index: {0}]   ;;  %s1617_s10 = inlined_call_operand.vmem [shape: f32[8,1], index: 10, kind: output, shape index: {1}]  }
   0x1   :  { %890 = vmatprep.subr.mxu0 %v1108_v0  ;;  %v35_v1 = vld [vmem:[%s1607_s2] sm:$0x7f]  ;;  %892 = vmatprep.mubr.msk.f32.mxu0 %vm1109_vm2, %v1108_v0  ;;  %v146_v4 = vld [vmem:[%s1609_s4 + $0x88] sm:$0xff]  ;;  %v1110_v7 = vmov 0.0|0.0   ;;  %v147_v10 = vld [vmem:[%s1609_s4 + $0x90] sm:$0xff]  ;;  %vm311_vm3 = vcmask 261120  }
   0x2   :  { %v34_v2 = vld [vmem:[%s1608_s1] sm:$0xff]  ;;  %891 = vmatpush3.msk.msra.mxu0 %vm47_vm0, %v35_v1  ;;  %v130_v6 = vld [vmem:[%s1609_s4 + $0x8] sm:$0xff]  ;;  %960 = vmatprep.subr.bf16.mxu1 %v1110_v7  ;;  %v148_v11 = vld [vmem:[%s1609_s4 + $0x98] sm:$0xff]  ;;  %vm237_vm4 = vcmask 523264   ;;  %vm705_vm5 = vcmask 15360   ;;  %vm734_vm7 = vcmask 7168  }
   0x3   :  { %v145_v3 = vld [vmem:[%s1609_s4 + $0x80] sm:$0xff]  ;;  %893 = vmatmul.mubr.msk.f32.vlgmr.msra.gmra.mrb[0].mxu0 %vm43_vm1, %v34_v2  ;;  %v131_v12 = vld [vmem:[%s1609_s4 + $0x10] sm:$0xff]  ;;  %911 = vmatprep.mubr.msk.f32.mxu1 %vm1109_vm2, %v1108_v0  ;;  %v976_v13 = vpack.c.bf16 %v148_v11, %v147_v10  ;;  %v132_v14 = vld [vmem:[%s1609_s4 + $0x18] sm:$0xff] }
   0x4   :  { %v129_v5 = vld [vmem:[%s1609_s4] sm:$0xff]  ;;  %v972_v8 = vpack.c.bf16 %v146_v4, %v145_v3  ;;  %v150_v16 = vld [vmem:[%s1609_s4 + $0xa8] sm:$0xff]  ;;  %v978_v17 = vpack.c.bf16 %v132_v14, %v131_v12  ;;  %v151_v21 = vld [vmem:[%s1609_s4 + $0xb0] sm:$0xff] }
   0x5   :  { %v974_v9 = vpack.c.bf16 %v130_v6, %v129_v5  ;;  %v149_v15 = vld [vmem:[%s1609_s4 + $0xa0] sm:$0xff]  ;;  %v134_v20 = vld [vmem:[%s1609_s4 + $0x28] sm:$0xff]  ;;  %v152_v22 = vld [vmem:[%s1609_s4 + $0xb8] sm:$0xff] }
   0x6   :  { %973 = vmatprep.subr.bf16.mxu0 %v972_v8  ;;  %v980_v18 = vpack.c.bf16 %v150_v16, %v149_v15  ;;  %v133_v19 = vld [vmem:[%s1609_s4 + $0x20] sm:$0xff]  ;;  %v230_v24 = vld [vmem:[%s1610_s5 + $0x8] sm:$0xff]  ;;  %v231_v27 = vld [vmem:[%s1610_s5 + $0x10] sm:$0xff]  ;;  %v984_v29 = vpack.c.bf16 %v152_v22, %v151_v21 }
   0x7   :  { %975 = vmatpush3.bf16.msra.mxu0 %v974_v9  ;;  %v229_v23 = vld [vmem:[%s1610_s5] sm:$0xff]  ;;  %v982_v26 = vpack.c.bf16 %v134_v20, %v133_v19  ;;  %v232_v28 = vld [vmem:[%s1610_s5 + $0x18] sm:$0xff]  ;;  %v135_v30 = vld [vmem:[%s1609_s4 + $0x30] sm:$0xff] }
   0x8   :  { %977 = vmatprep.subr.bf16.mxu0 %v976_v13  ;;  %v961_v25 = vpack.c.bf16 %v230_v24, %v229_v23  ;;  %v136_v31 = vld [vmem:[%s1609_s4 + $0x38] sm:$0xff]  ;;  %v153_v32 = vld [vmem:[%s1609_s4 + $0xc0] sm:$0xff]  ;;  %v964_v33 = vpack.c.bf16 %v232_v28, %v231_v27  ;;  %v154_v34 = vld [vmem:[%s1609_s4 + $0xc8] sm:$0xff] }
   0x9   :  { %v233_v35 = vld [vmem:[%s1610_s5 + $0x20] sm:$0xff]  ;;  %v234_v36 = vld [vmem:[%s1610_s5 + $0x28] sm:$0xff]  ;;  %v986_v37 = vpack.c.bf16 %v136_v31, %v135_v30  ;;  %v988_v38 = vpack.c.bf16 %v154_v34, %v153_v32  ;;  %v155_v42 = vld [vmem:[%s1609_s4 + $0xd0] sm:$0xff] }
   0xa   :  { %962 = vmatpush3.bf16.msra.mxu1 %v961_v25  ;;  %v137_v39 = vld [vmem:[%s1609_s4 + $0x40] sm:$0xff]  ;;  %v138_v40 = vld [vmem:[%s1609_s4 + $0x48] sm:$0xff]  ;;  %v967_v41 = vpack.c.bf16 %v234_v36, %v233_v35  ;;  %v156_v43 = vld [vmem:[%s1609_s4 + $0xd8] sm:$0xff] }
   0xb   :  { %979 = vmatpush3.bf16.msra.mxu0 %v978_v17  ;;  %963 = vmatprep.subr.bf16.mxu1 %v1110_v7  ;;  %v990_v44 = vpack.c.bf16 %v138_v40, %v137_v39  ;;  %v992_v45 = vpack.c.bf16 %v156_v43, %v155_v42  ;;  %v139_v46 = vld [vmem:[%s1609_s4 + $0x50] sm:$0xff]  ;;  %v140_v47 = vld [vmem:[%s1609_s4 + $0x58] sm:$0xff]  ;;  %v157_v48 = vld [vmem:[%s1609_s4 + $0xe0] sm:$0xff] }
   0xc   :  { %981 = vmatprep.subr.bf16.mxu0 %v980_v18  ;;  %v158_v49 = vld [vmem:[%s1609_s4 + $0xe8] sm:$0xff]  ;;  %v994_v50 = vpack.c.bf16 %v140_v47, %v139_v46  ;;  %v141_v52 = vld [vmem:[%s1609_s4 + $0x60] sm:$0xff]  ;;  %v159_v54 = vld [vmem:[%s1609_s4 + $0xf0] sm:$0xff] }
   0xd   :  { %v996_v51 = vpack.c.bf16 %v158_v49, %v157_v48  ;;  %v142_v53 = vld [vmem:[%s1609_s4 + $0x68] sm:$0xff]  ;;  %v160_v55 = vld [vmem:[%s1609_s4 + $0xf8] sm:$0xff]  ;;  %v143_v58 = vld [vmem:[%s1609_s4 + $0x70] sm:$0xff] }
   0xe   :  { %965 = vmatpush3.bf16.msra.mxu1 %v964_v33  ;;  %v998_v56 = vpack.c.bf16 %v142_v53, %v141_v52  ;;  %v1000_v57 = vpack.c.bf16 %v160_v55, %v159_v54  ;;  %v144_v59 = vld [vmem:[%s1609_s4 + $0x78] sm:$0xff]  ;;  %v235_v61 = vld [vmem:[%s1610_s5 + $0x30] sm:$0xff]  ;;  %v209_v1 = vld [vmem:[%s1609_s4 + $0x280] sm:$0xff] }
   0xf   :  { %983 = vmatpush3.bf16.msra.mxu0 %v982_v26  ;;  %966 = vmatprep.subr.bf16.mxu1 %v1110_v7  ;;  %v1002_v60 = vpack.c.bf16 %v144_v59, %v143_v58  ;;  %v236_v62 = vld [vmem:[%s1610_s5 + $0x38] sm:$0xff]  ;;  %v210_v2 = vld [vmem:[%s1609_s4 + $0x288] sm:$0xff]  ;;  %v193_v5 = vld [vmem:[%s1609_s4 + $0x200] sm:$0xff] }
  0x10   :  { %985 = vmatprep.subr.bf16.mxu0 %v984_v29  ;;  %v970_v63 = vpack.c.bf16 %v236_v62, %v235_v61  ;;  %v123_v3 = vld [vmem:[%s1611_s0 + $0x8] sm:$0xff]  ;;  %v1036_v4 = vpack.c.bf16 %v210_v2, %v209_v1  ;;  %v122_v8 = vld [vmem:[%s1611_s0] sm:$0xff]  ;;  %v211_v13 = vld [vmem:[%s1609_s4 + $0x290] sm:$0xff] }
  0x11   :  { %v194_v6 = vld [vmem:[%s1609_s4 + $0x208] sm:$0xff]  ;;  %379 = vmatprep.mubr.f32.mxu0 %v123_v3  ;;  %v177_v10 = vld [vmem:[%s1609_s4 + $0x180] sm:$0xff]  ;;  %v212_v14 = vld [vmem:[%s1609_s4 + $0x298] sm:$0xff] }
  0x12   :  { %968 = vmatpush3.bf16.msra.mxu1 %v967_v41  ;;  %v1038_v9 = vpack.c.bf16 %v194_v6, %v193_v5  ;;  %v178_v11 = vld [vmem:[%s1609_s4 + $0x188] sm:$0xff]  ;;  %v1040_v15 = vpack.c.bf16 %v212_v14, %v211_v13  ;;  %v195_v16 = vld [vmem:[%s1609_s4 + $0x210] sm:$0xff]  ;;  %v196_v17 = vld [vmem:[%s1609_s4 + $0x218] sm:$0xff] }
  0x13   :  { %987 = vmatpush3.bf16.msra.mxu0 %v986_v37  ;;  %969 = vmatprep.subr.bf16.mxu1 %v1110_v7  ;;  %v1004_v12 = vpack.c.bf16 %v178_v11, %v177_v10  ;;  %v1042_v18 = vpack.c.bf16 %v196_v17, %v195_v16  ;;  %v213_v19 = vld [vmem:[%s1609_s4 + $0x2a0] sm:$0xff]  ;;  %v214_v20 = vld [vmem:[%s1609_s4 + $0x2a8] sm:$0xff]  ;;  %v215_v25 = vld [vmem:[%s1609_s4 + $0x2b0] sm:$0xff] }
  0x14   :  { %989 = vmatprep.subr.bf16.mxu0 %v988_v38  ;;  %v1044_v21 = vpack.c.bf16 %v214_v20, %v213_v19  ;;  %v197_v22 = vld [vmem:[%s1609_s4 + $0x220] sm:$0xff]  ;;  %v198_v23 = vld [vmem:[%s1609_s4 + $0x228] sm:$0xff]  ;;  %v216_v26 = vld [vmem:[%s1609_s4 + $0x2b8] sm:$0xff] }
  0x15   :  { %v1046_v24 = vpack.c.bf16 %v198_v23, %v197_v22  ;;  %v1048_v27 = vpack.c.bf16 %v216_v26, %v215_v25  ;;  %v199_v28 = vld [vmem:[%s1609_s4 + $0x230] sm:$0xff]  ;;  %v200_v29 = vld [vmem:[%s1609_s4 + $0x238] sm:$0xff]  ;;  %v217_v31 = vld [vmem:[%s1609_s4 + $0x2c0] sm:$0xff] }
  0x16   :  { %971 = vmatpush3.bf16.msra.mxu1 %v970_v63  ;;  %v1050_v30 = vpack.c.bf16 %v200_v29, %v199_v28  ;;  %v218_v32 = vld [vmem:[%s1609_s4 + $0x2c8] sm:$0xff]  ;;  %v201_v34 = vld [vmem:[%s1609_s4 + $0x240] sm:$0xff]  ;;  %v219_v37 = vld [vmem:[%s1609_s4 + $0x2d0] sm:$0xff] }
  0x17   :  { %991 = vmatpush3.bf16.msra.mxu0 %v990_v44  ;;  %1005 = vmatprep.subr.bf16.mxu1 %v1004_v12  ;;  %v1052_v33 = vpack.c.bf16 %v218_v32, %v217_v31  ;;  %v202_v35 = vld [vmem:[%s1609_s4 + $0x248] sm:$0xff]  ;;  %v220_v38 = vld [vmem:[%s1609_s4 + $0x2d8] sm:$0xff]  ;;  %v203_v40 = vld [vmem:[%s1609_s4 + $0x250] sm:$0xff] }
  0x18   :  { %993 = vmatprep.subr.bf16.mxu0 %v992_v45  ;;  %v1054_v36 = vpack.c.bf16 %v202_v35, %v201_v34  ;;  %v1056_v39 = vpack.c.bf16 %v220_v38, %v219_v37  ;;  %v204_v41 = vld [vmem:[%s1609_s4 + $0x258] sm:$0xff]  ;;  %v221_v43 = vld [vmem:[%s1609_s4 + $0x2e0] sm:$0xff]  ;;  %v222_v44 = vld [vmem:[%s1609_s4 + $0x2e8] sm:$0xff] }
  0x19   :  { %v1058_v42 = vpack.c.bf16 %v204_v41, %v203_v40  ;;  %v1060_v45 = vpack.c.bf16 %v222_v44, %v221_v43  ;;  %v205_v46 = vld [vmem:[%s1609_s4 + $0x260] sm:$0xff]  ;;  %v206_v47 = vld [vmem:[%s1609_s4 + $0x268] sm:$0xff]  ;;  %v223_v49 = vld [vmem:[%s1609_s4 + $0x2f0] sm:$0xff] }
  0x1a   :  { %v1062_v48 = vpack.c.bf16 %v206_v47, %v205_v46  ;;  %v207_v52 = vld [vmem:[%s1609_s4 + $0x270] sm:$0xff]  ;;  %v208_v53 = vld [vmem:[%s1609_s4 + $0x278] sm:$0xff]  ;;  %v225_v55 = vld [vmem:[%s1609_s4 + $0x300] sm:$0xff] }
  0x1b   :  { %995 = vmatpush3.bf16.msra.mxu0 %v994_v50  ;;  %v224_v50 = vld [vmem:[%s1609_s4 + $0x2f8] sm:$0xff]  ;;  %v1066_v54 = vpack.c.bf16 %v208_v53, %v207_v52  ;;  %v126_v58 = vld [vmem:[%s1611_s0 + $0x20] sm:$0xff]  ;;  %v128_v63 = vld [vmem:[%s1611_s0 + $0x30] sm:$0xff] }
  0x1c   :  { %997 = vmatprep.subr.bf16.mxu0 %v996_v51  ;;  %v1064_v51 = vpack.c.bf16 %v224_v50, %v223_v49  ;;  %v228_v61 = vld [vmem:[%s1609_s4 + $0x318] sm:$0xff]  ;;  %v744_v1 = vld [vmem:[%s1612_s3] ss:$0 sm:$0xff]  ;;  %v162_v3 = vld [vmem:[%s1609_s4 + $0x108] sm:$0xff] }
  0x1d   :  { %v161_v2 = vld [vmem:[%s1609_s4 + $0x100] sm:$0xff]  ;;  %v179_v5 = vld [vmem:[%s1609_s4 + $0x190] sm:$0xff]  ;;  %v180_v6 = vld [vmem:[%s1609_s4 + $0x198] sm:$0xff] }
  0x1e   :  { %v1006_v10 = vpack.c.bf16 %v162_v3, %v161_v2  ;;  %v1008_v12 = vpack.c.bf16 %v180_v6, %v179_v5  ;;  %v163_v13 = vld [vmem:[%s1609_s4 + $0x110] sm:$0xff]  ;;  %v164_v14 = vld [vmem:[%s1609_s4 + $0x118] sm:$0xff]  ;;  %v181_v16 = vld [vmem:[%s1609_s4 + $0x1a0] sm:$0xff] }
  0x1f   :  { %999 = vmatpush3.bf16.msra.mxu0 %v998_v56  ;;  %v226_v56 = vld [vmem:[%s1609_s4 + $0x308] sm:$0xff]  ;;  %v165_v20 = vld [vmem:[%s1609_s4 + $0x120] sm:$0xff]  ;;  %v183_v22 = vld [vmem:[%s1609_s4 + $0x1b0] sm:$0xff] }
  0x20   :  { %1001 = vmatprep.subr.bf16.mxu0 %v1000_v57  ;;  %v127_v57 = vld [vmem:[%s1611_s0 + $0x28] sm:$0xff]  ;;  %v1069_v59 = vpack.c.bf16 %v226_v56, %v225_v55  ;;  %v184_v23 = vld [vmem:[%s1609_s4 + $0x1b8] sm:$0xff]  ;;  %v167_v26 = vld [vmem:[%s1609_s4 + $0x130] sm:$0xff] }
  0x21   :  { %v182_v17 = vld [vmem:[%s1609_s4 + $0x1a8] sm:$0xff]  ;;  %v1016_v25 = vpack.c.bf16 %v184_v23, %v183_v22  ;;  %v185_v28 = vld [vmem:[%s1609_s4 + $0x1c0] sm:$0xff]  ;;  %v187_v34 = vld [vmem:[%s1609_s4 + $0x1d0] sm:$0xff] }
  0x22   :  { %v1012_v19 = vpack.c.bf16 %v182_v17, %v181_v16  ;;  %v186_v29 = vld [vmem:[%s1609_s4 + $0x1c8] sm:$0xff]  ;;  %v169_v32 = vld [vmem:[%s1609_s4 + $0x140] sm:$0xff]  ;;  %v188_v35 = vld [vmem:[%s1609_s4 + $0x1d8] sm:$0xff] }
  0x23   :  { %1003 = vmatpush3.bf16.msra.mxu0 %v1002_v60  ;;  %v227_v60 = vld [vmem:[%s1609_s4 + $0x310] sm:$0xff]  ;;  %v1020_v31 = vpack.c.bf16 %v186_v29, %v185_v28  ;;  %v1024_v37 = vpack.c.bf16 %v188_v35, %v187_v34  ;;  %v189_v40 = vld [vmem:[%s1609_s4 + $0x1e0] sm:$0xff]  ;;  %v190_v41 = vld [vmem:[%s1609_s4 + $0x1e8] sm:$0xff] }
  0x24   :  { %1037 = vmatprep.subr.bf16.mxu0 %v1036_v4  ;;  %v1072_v62 = vpack.c.bf16 %v228_v61, %v227_v60  ;;  %v171_v38 = vld [vmem:[%s1609_s4 + $0x150] sm:$0xff]  ;;  %v1028_v43 = vpack.c.bf16 %v190_v41, %v189_v40  ;;  %v173_v44 = vld [vmem:[%s1609_s4 + $0x160] sm:$0xff]  ;;  %v192_v47 = vld [vmem:[%s1609_s4 + $0x1f8] sm:$0xff] }
  0x25   :  { %v191_v46 = vld [vmem:[%s1609_s4 + $0x1f0] sm:$0xff]  ;;  %v611_v3 = vld [vmem:[%s1613_s7 + $0x38] sm:$0xff]  ;;  %v612_v5 = vld [vmem:[%s1613_s7 + $0x40] sm:$0xff] }
  0x26   :  { %380 = vmatmul.mubr.f32.vlgmr.msra.gmra.mrb[2].mxu0 %v122_v8  ;;  %v1032_v49 = vpack.c.bf16 %v192_v47, %v191_v46  ;;  %v175_v50 = vld [vmem:[%s1609_s4 + $0x170] sm:$0xff]  ;;  %v613_v6 = vld [vmem:[%s1613_s7 + $0x48] sm:$0xff]  ;;  %v750_v34 = vld [vmem:[%s1615_s8] ss:$0 sm:$0xff] }
  0x27   :  { %1039 = vmatpush3.bf16.msra.mxu0 %v1038_v9  ;;  %519 = vmatprep.mubr.f32.mxu0 %v127_v57  ;;  %v124_v53 = vld [vmem:[%s1611_s0 + $0x10] sm:$0xff]  ;;  %v604_v57 = vld [vmem:[%s1613_s7] sm:$0xff]  ;;  %v617_v16 = vld [vmem:[%s1613_s7 + $0x68] sm:$0xff] }
  0x28   :  { %1041 = vmatprep.subr.bf16.mxu0 %v1040_v15  ;;  %v125_v15 = vld [vmem:[%s1611_s0 + $0x18] sm:$0xff]  ;;  %v610_v2 = vld [vmem:[%s1613_s7 + $0x30] sm:$0xff] }
  0x2b   :  { %1043 = vmatpush3.bf16.msra.mxu0 %v1042_v18  ;;  %v1010_v18 = vpack.c.bf16 %v164_v14, %v163_v13 }
  0x2c   :  { %1045 = vmatprep.subr.bf16.mxu0 %v1044_v21  ;;  %v166_v21 = vld [vmem:[%s1609_s4 + $0x128] sm:$0xff] }
  0x2f   :  { %1047 = vmatpush3.bf16.msra.mxu0 %v1046_v24  ;;  %v1014_v24 = vpack.c.bf16 %v166_v21, %v165_v20  ;;  %v618_v20 = vld [vmem:[%s1613_s7 + $0x70] sm:$0xff]  ;;  %v619_v21 = vld [vmem:[%s1613_s7 + $0x78] sm:$0xff] }
  0x30   :  { %1049 = vmatprep.subr.bf16.mxu0 %v1048_v27  ;;  %v168_v27 = vld [vmem:[%s1609_s4 + $0x138] sm:$0xff]  ;;  %v1096_v22 = vpack.c.bf16 %v619_v21, %v618_v20 }
  0x33   :  { %1051 = vmatpush3.bf16.msra.mxu0 %v1050_v30  ;;  %v1018_v30 = vpack.c.bf16 %v168_v27, %v167_v26 }
  0x34   :  { %1053 = vmatprep.subr.bf16.mxu0 %v1052_v33  ;;  %v170_v33 = vld [vmem:[%s1609_s4 + $0x148] sm:$0xff] }
  0x37   :  { %1055 = vmatpush3.bf16.msra.mxu0 %v1054_v36  ;;  %v1022_v36 = vpack.c.bf16 %v170_v33, %v169_v32 }
  0x38   :  { %1057 = vmatprep.subr.bf16.mxu0 %v1056_v39  ;;  %v172_v39 = vld [vmem:[%s1609_s4 + $0x158] sm:$0xff] }
  0x3b   :  { %1059 = vmatpush3.bf16.msra.mxu0 %v1058_v42  ;;  %v1026_v42 = vpack.c.bf16 %v172_v39, %v171_v38 }
  0x3c   :  { %1061 = vmatprep.subr.bf16.mxu0 %v1060_v45  ;;  %v174_v45 = vld [vmem:[%s1609_s4 + $0x168] sm:$0xff] }
  0x3f   :  { %1063 = vmatpush3.bf16.msra.mxu0 %v1062_v48  ;;  %v1030_v48 = vpack.c.bf16 %v174_v45, %v173_v44 }
  0x40   :  { %1065 = vmatprep.subr.bf16.mxu0 %v1064_v51  ;;  %v176_v51 = vld [vmem:[%s1609_s4 + $0x178] sm:$0xff] }
  0x41   :  { %v1034_v52 = vpack.c.bf16 %v176_v51, %v175_v50 }
  0x43   :  { %1067 = vmatpush3.bf16.msra.mxu0 %v1066_v54 }
  0x44   :  { %1068 = vmatprep.subr.bf16.mxu0 %v1110_v7 }
  0x46   :  { %520 = vmatmul.mubr.f32.vlgmr.msra.gmra.mrb[4].mxu0 %v126_v58  ;;  %v605_v58 = vld [vmem:[%s1613_s7 + $0x8] sm:$0xff] }
  0x47   :  { %1070 = vmatpush3.bf16.msra.mxu0 %v1069_v59  ;;  %922 = vmatprep.mubr.msk.f32.mxu0 %vm1109_vm2, %v1108_v0  ;;  %v606_v59 = vld [vmem:[%s1613_s7 + $0x10] sm:$0xff]  ;;  %v1075_v60 = vpack.c.bf16 %v605_v58, %v604_v57 }
  0x48   :  { %1071 = vmatprep.subr.bf16.mxu0 %v1110_v7 }
  0x4b   :  { %1073 = vmatpush3.bf16.msra.mxu0 %v1072_v62  ;;  %v608_v62 = vld [vmem:[%s1613_s7 + $0x20] sm:$0xff] }
  0x4e   :  { %923 = vmatmul.mubr.msk.f32.vlgmr.msra.gmra.mrb[6].mxu0 %vm311_vm3, %v128_v63  ;;  %v609_v63 = vld [vmem:[%s1613_s7 + $0x28] sm:$0xff] }
  0xd6   :  { %v117_v4 = vpop.f32.mrb[0].mxu0 }
  0xd7   :  { %v118_v8 = vadd.f32 %v744_v1, %v117_v4  ;;  %v894_v9 = vpop.f32.mrb[1].mxu0  ;;  %v1081_v1 = vpack.c.bf16 %v609_v63, %v608_v62  ;;  %v1084_v4 = vpack.c.bf16 %v611_v3, %v610_v2 }
  0xd9   :  { %v121_v11 = vmax.f32 %v118_v8, 0.0  ;;  %v1087_v8 = vpack.c.bf16 %v613_v6, %v612_v5 }
  0xdb   :  { %912 = vmatmul.mubr.msk.f32.vlgmr.msra.gmra.mrb[0].mxu1 %vm237_vm4, %v121_v11  ;;  %v614_v11 = vld [vmem:[%s1613_s7 + $0x50] sm:$0xff] }
  0xdc   :  { %1007 = vmatpush3.bf16.msra.mxu1 %v1006_v10  ;;  %449 = vmatprep.mubr.f32.mxu1 %v125_v15  ;;  %v616_v15 = vld [vmem:[%s1613_s7 + $0x60] sm:$0xff] }
  0xdd   :  { %1009 = vmatprep.subr.bf16.mxu1 %v1008_v12  ;;  %v615_v12 = vld [vmem:[%s1613_s7 + $0x58] sm:$0xff]  ;;  %v1093_v17 = vpack.c.bf16 %v617_v16, %v616_v15 }
  0xde   :  { %v1090_v14 = vpack.c.bf16 %v615_v12, %v614_v11 }
  0xe0   :  { %1011 = vmatpush3.bf16.msra.mxu1 %v1010_v18 }
  0xe1   :  { %1013 = vmatprep.subr.bf16.mxu1 %v1012_v19 }
  0xe4   :  { %1015 = vmatpush3.bf16.msra.mxu1 %v1014_v24 }
  0xe5   :  { %1017 = vmatprep.subr.bf16.mxu1 %v1016_v25 }
  0xe8   :  { %1019 = vmatpush3.bf16.msra.mxu1 %v1018_v30 }
  0xe9   :  { %1021 = vmatprep.subr.bf16.mxu1 %v1020_v31 }
  0xec   :  { %1023 = vmatpush3.bf16.msra.mxu1 %v1022_v36 }
  0xed   :  { %1025 = vmatprep.subr.bf16.mxu1 %v1024_v37 }
  0xf0   :  { %1027 = vmatpush3.bf16.msra.mxu1 %v1026_v42 }
  0xf1   :  { %1029 = vmatprep.subr.bf16.mxu1 %v1028_v43 }
  0xf4   :  { %1031 = vmatpush3.bf16.msra.mxu1 %v1030_v48 }
  0xf5   :  { %1033 = vmatprep.subr.bf16.mxu1 %v1032_v49 }
  0xf8   :  { %1035 = vmatpush3.bf16.msra.mxu1 %v1034_v52 }
  0xf9   :  { %1074 = vmatprep.subr.bf16.mxu1 %v1110_v7  ;;  %v795_v54 = vpop.f32.mrb[2].mxu0 }
  0xfa   :  { %v796_v55 = vpop.f32.mrb[3].mxu0 }
  0xfb   :  { %450 = vmatmul.mubr.f32.vlgmr.msra.gmra.mrb[2].mxu1 %v124_v53  ;;  %v797_v56 = vadd.f32 %v796_v55, %v795_v54 }
  0xfc   :  { %957 = vmatprep.mubr.msk.f32.mxu1 %vm1109_vm2, %v1108_v0  ;;  %v607_v0 = vld [vmem:[%s1613_s7 + $0x18] sm:$0xff]  ;;  %1076 = vmatpush3.bf16.msra.mxu1 %v1075_v60 }
  0xfd   :  { %v1078_v61 = vpack.c.bf16 %v607_v0, %v606_v59  ;;  %1077 = vmatprep.subr.bf16.mxu1 %v1110_v7 }
 0x100   :  { %1079 = vmatpush3.bf16.msra.mxu1 %v1078_v61 }
 0x101   :  { %1080 = vmatprep.subr.bf16.mxu1 %v1110_v7 }
 0x104   :  { %1082 = vmatpush3.bf16.msra.mxu1 %v1081_v1 }
 0x105   :  { %1083 = vmatprep.subr.bf16.mxu1 %v1110_v7 }
 0x108   :  { %1085 = vmatpush3.bf16.msra.mxu1 %v1084_v4 }
 0x109   :  { %1086 = vmatprep.subr.bf16.mxu1 %v1110_v7 }
 0x10c   :  { %1088 = vmatpush3.bf16.msra.mxu1 %v1087_v8 }
 0x10d   :  { %1089 = vmatprep.subr.bf16.mxu1 %v1110_v7 }
 0x110   :  { %1091 = vmatpush3.bf16.msra.mxu1 %v1090_v14 }
 0x111   :  { %1092 = vmatprep.subr.bf16.mxu1 %v1110_v7 }
 0x114   :  { %1094 = vmatpush3.bf16.msra.mxu1 %v1093_v17 }
 0x115   :  { %1095 = vmatprep.subr.bf16.mxu1 %v1110_v7  ;;  %v749_v7 = vld [vmem:[%s1614_s6] ss:$0 sm:$0xff]  ;;  %s1111_s6 = smov 126  }
 0x118   :  { %1097 = vmatpush3.bf16.msra.mxu1 %v1096_v22 }
 0x119   :  { %v865_v9 = vpop.f32.mrb[4].mxu0 }
 0x11a   :  { %v866_v10 = vpop.f32.mrb[5].mxu0 }
 0x11b   :  { %v867_v13 = vadd.f32 %v866_v10, %v865_v9 }
 0x121   :  { %v591_v18 = vpop.f32.mrb[6].mxu0 }
 0x122   :  { %v924_v19 = vpop.f32.mrb[7].mxu0 }
 0x1ae   :  { %v307_v23 = vpop.f32.mrb[0].mxu1 }
 0x1af   :  { %v382_v24 = vadd.f32 %v797_v56, %v307_v23  ;;  %v913_v25 = vpop.f32.mrb[1].mxu1 }
 0x1ce   :  { %v830_v26 = vpop.f32.mrb[2].mxu1 }
 0x1cf   :  { %v831_v27 = vpop.f32.mrb[3].mxu1 }
 0x1d0   :  { %v832_v28 = vadd.f32 %v831_v27, %v830_v26 }
 0x1d2   :  { %v452_v29 = vadd.f32 %v832_v28, %v382_v24 }
 0x1d4   :  { %v522_v30 = vadd.f32 %v867_v13, %v452_v29 }
 0x1d6   :  { %v592_v31 = vadd.f32 %v591_v18, %v522_v30 }
 0x1d8   :  { %v602_v32 = vadd.f32 %v749_v7, %v592_v31 }
 0x1da   :  { %v603_v33 = vmax.f32 %v602_v32, 0.0 }
 0x1dc   :  { %958 = vmatmul.mubr.f32.vlgmr.msra.gmra.mrb[4].mxu1 %v603_v33 }
 0x2af   :  { %v693_v35 = vpop.f32.mrb[4].mxu1 }
 0x2b0   :  { %v694_v36 = vadd.f32 %v750_v34, %v693_v35  ;;  %v959_v37 = vpop.f32.mrb[5].mxu1 }
 0x2b2   :  { %1102 = vtanh.f32 %v694_v36  ;;  %v697_v38 = vmax.f32 %v694_v36, -20.0  ;;  %v709_v39 = vmul.f32 -2.0, %v694_v36  ;;  %v725_v58 = vsub.f32 0.6931472, %v694_v36 }
 0x2b4   :  { %v698_v40 = vmin.f32 %v697_v38, 2.0  ;;  %v711_v41 = vand.u32 2147483647, %v709_v39  ;;  %v710_v55 = vmax.f32 %v709_v39, 0.0 }
 0x2b6   :  { %v699_v42 = vsub.f32 0.0, %v698_v40  ;;  %v712_v43 = vsub.f32 0.0, %v711_v41 }
 0x2b8   :  { %v751_v44 = vadd.f32 -0.9189385, %v699_v42  ;;  %v713_v45 = vmul.f32 1.442695, %v712_v43 }
 0x2ba   :  { %702 = vrot.lane.b32.xlu0 %v751_v44, %s1111_s6  ;;  %1104 = vpow2.f32 %v713_v45 }
 0x2bc   :  { %v1103_v46 = vpop.eup %1102 }
 0x2bd   :  { %733 = vst.msk [vmem:[%s1616_s9] sm:$0xff] %vm705_vm5, %v1103_v46 }
 0x2c4   :  { %v1105_v47 = vpop.eup %1104 }
 0x2c5   :  { %v715_v48 = vadd.f32 1.0, %v1105_v47  ;;  %v718_v49 = vmul.f32 -0.5, %v1105_v47  ;;  %v721_v51 = vand.u32 2147483647, %v1105_v47 }
 0x2c7   :  { %1106 = vlog2.f32 %v715_v48  ;;  %v719_v50 = vadd.f32 1.0, %v718_v49  ;;  %vm722_vm6 = vcmp.lt.f32.partialorder %v721_v51, 0.0004427343 }
 0x2c9   :  { %v720_v54 = vmul.f32 %v1105_v47, %v719_v50 }
 0x2d1   :  { %v1107_v52 = vpop.eup %1106 }
 0x2d2   :  { %v717_v53 = vmul.f32 0.6931472, %v1107_v52 }
 0x2d4   :  { %v723_v56 = vsel %vm722_vm6, %v720_v54, %v717_v53 }
 0x2d5   :  { %v724_v57 = vadd.f32 %v723_v56, %v710_v55 }
 0x2d7   :  { %v726_v59 = vsub.f32 %v725_v58, %v724_v57 }
 0x2d9   :  { %v727_v60 = vmul.f32 2.0, %v726_v59 }
 0x2db   :  { %v728_v0 = vsel %vm705_vm5, %v727_v60, 0.0 }
 0x2dc   :  { %729 = vadd.xlane.f32.xlu1 %v728_v0 }
 0x32c   :  { %v703_v61 = vpop.permute.xlu0 %702 }
 0x32d   :  { %v706_v62 = vsel %vm705_vm5, %v703_v61, 0.0 }
 0x32e   :  { %707 = vadd.xlane.f32.xlu0 %v706_v62 }
 0x369   :  { %v730_v63 = vpop.xlane.xlu1 %729 }
 0x3bb   :  { %v708_v1 = vpop.xlane.xlu0 %707 }
 0x3bc   :  { %v731_v2 = vsub.f32 %v708_v1, %v730_v63 }
 0x3be   :  { %735 = vst.msk [vmem:[%s1617_s10] sm:$0xff] %vm734_vm7, %v731_v2 }

</bundles_post_ra>
